<compile_context>
chip_gen: v7x
topology: tpu7x:2x2x1
jax: 0.10.0
libtpu: 0.0.40
codegen_flags: <defaults>
</compile_context>

<pallas_src>
import functools

import jax
import jax.numpy as jnp
from jax.experimental import pallas as pl
from jax.experimental.pallas import tpu as pltpu


def _round_up(v, m):
    return (v + m - 1) // m * m


@functools.lru_cache(maxsize=1)
def _hw_vmem_cap():
    try:
        info = pltpu.get_tpu_info()
        cap = getattr(info, "vmem_capacity_bytes", None)
        if cap:
            return int(cap)
    except Exception:
        pass
    return 64 * 1024 * 1024  # conservative (v7x per-TC) fallback


def _vmem_limit_bytes(estimate):
    cap = _hw_vmem_cap()
    return int(min(max(int(estimate), 32 * 1024 * 1024), int(0.9 * cap)))


def _apply_act(y, act, negative_slope):
    if act == "relu":
        return jnp.maximum(y, 0.0)
    if act == "leaky_relu":
        return jnp.where(y >= 0.0, y, negative_slope * y)
    return y


# -------------------- stride-1 dilated conv: tap-accumulation kernel -----------------
# grid = (N, Do, kd); input block = one padded depth slice, auto-pipelined.
# Per depth tap: build an in-VMEM im2col of the 9 (kh,kw) shifted windows
# (chunked over output rows) and do ONE matmul with K = kh*kw*Cin; the MXU does
# the K reduction in f32, and results accumulate in a VMEM f32 scratch across
# the kd grid axis.  Conv + folded BN + activation fused in the epilogue.

def _tap_conv_kernel(x_ref, w_ref, scale_ref, shift_ref, out_ref, acc_ref, *,
                     kd, kh, kw, dh, dw, Ho, Wo, Cout, act, negative_slope,
                     rows_per_chunk):
    a = pl.program_id(2)                       # depth tap (reduction, innermost)
    Cinp = x_ref.shape[-1]
    Ncp = acc_ref.shape[-1]
    wk = w_ref[a]                              # (kh*kw*Cinp, Ncp) for this tap

    for r0 in range(0, Ho, rows_per_chunk):
        rc = min(rows_per_chunk, Ho - r0)
        cols = []
        for b in range(kh):
            for c in range(kw):
                win = x_ref[0, 0,
                            r0 + b * dh:r0 + b * dh + rc,
                            c * dw:c * dw + Wo, :]
                cols.append(win.reshape(rc * Wo, Cinp))
        lhs = cols[0] if len(cols) == 1 else jnp.concatenate(cols, axis=-1)
        part = jnp.dot(lhs, wk, preferred_element_type=jnp.float32)
        rows = pl.ds(r0 * Wo, rc * Wo)

        @pl.when(a == 0)                       # first tap writes (no zero-init)
        def _():
            acc_ref[rows, :] = part

        @pl.when(a > 0)
        def _():
            acc_ref[rows, :] += part

    @pl.when(a == kd - 1)
    def _():
        y = acc_ref[...] * scale_ref[...] + shift_ref[...]
        y = _apply_act(y, act, negative_slope)               # (Ho*Wo, Ncp) f32
        y = y.reshape(1, 1, Ho, Wo, Ncp)[..., :Cout]
        out_ref[...] = y.astype(out_ref.dtype)


def conv3d_same_bn_act(x, w, scale, shift, *, dilation=(1, 1, 1), padding=(1, 1, 1),
                       act="none", negative_slope=0.2,
                       compute_dtype=jnp.bfloat16, out_dtype=None,
                       cin_pad_to=64, lhs_chunk_bytes=4 * 1024 * 1024):
    """Stride-1 Conv3d + folded BatchNorm + activation, NDHWC, no HBM im2col."""
    N, D, H, W, Cin = x.shape
    kd, kh, kw, Cin2, Cout = w.shape
    assert Cin == Cin2
    dd, dh, dw = dilation
    pd, ph, pw = padding
    assert dd == 1, "tap kernel assumes depth dilation == 1 (true for all layers)"
    Do = D + 2 * pd - (kd - 1) * dd
    Ho = H + 2 * ph - (kh - 1) * dh
    Wo = W + 2 * pw - (kw - 1) * dw
    out_dtype = compute_dtype if out_dtype is None else out_dtype

    Cinp = _round_up(Cin, cin_pad_to)              # aligned lane width for windows
    Ncp = _round_up(Cout, 128)                     # lane-friendly MXU output width
    csize = jnp.dtype(compute_dtype).itemsize
    osize = jnp.dtype(out_dtype).itemsize

    xp = jnp.pad(x.astype(compute_dtype),
                 ((0, 0), (pd, pd), (ph, ph), (pw, pw), (0, Cinp - Cin)))
    Hp, Wp = H + 2 * ph, W + 2 * pw
    wk = jnp.pad(w.astype(compute_dtype),
                 ((0, 0), (0, 0), (0, 0), (0, Cinp - Cin), (0, Ncp - Cout)))
    wk = wk.reshape(kd, kh * kw * Cinp, Ncp)
    scale_p = jnp.pad(scale.astype(jnp.float32), (0, Ncp - Cout)).reshape(1, Ncp)
    shift_p = jnp.pad(shift.astype(jnp.float32), (0, Ncp - Cout)).reshape(1, Ncp)

    khw = kh * kw
    row_bytes = Wo * khw * Cinp * csize
    rows_per_chunk = max(1, min(Ho, lhs_chunk_bytes // row_bytes))

    kernel = functools.partial(
        _tap_conv_kernel, kd=kd, kh=kh, kw=kw, dh=dh, dw=dw,
        Ho=Ho, Wo=Wo, Cout=Cout, act=act, negative_slope=negative_slope,
        rows_per_chunk=rows_per_chunk)

    est = (2 * Hp * Wp * Cinp * csize                 # input slice (double-buffered)
           + 2 * kd * khw * Cinp * Ncp * csize        # resident weights
           + 2 * Ho * Wo * Cout * osize               # output block
           + Ho * Wo * Ncp * 4                        # f32 accumulator
           + 3 * rows_per_chunk * Wo * khw * Cinp * csize   # im2col chunk + temps
           + 2 * rows_per_chunk * Wo * Ncp * 4        # per-chunk matmul result
           + (8 << 20))

    return pl.pallas_call(
        kernel,
        out_shape=jax.ShapeDtypeStruct((N, Do, Ho, Wo, Cout), out_dtype),
        grid_spec=pltpu.PrefetchScalarGridSpec(
            num_scalar_prefetch=0,
            grid=(N, Do, kd),
            in_specs=[
                # one padded depth slice per (n, do, a); overlapping reads along a
                pl.BlockSpec((1, 1, Hp, Wp, Cinp), lambda n, d, a: (n, d + a, 0, 0, 0)),
                # weights / folded-BN params fully VMEM-resident (constant index)
                pl.BlockSpec((kd, khw * Cinp, Ncp), lambda n, d, a: (0, 0, 0)),
                pl.BlockSpec((1, Ncp), lambda n, d, a: (0, 0)),
                pl.BlockSpec((1, Ncp), lambda n, d, a: (0, 0)),
            ],
            out_specs=pl.BlockSpec((1, 1, Ho, Wo, Cout),
                                   lambda n, d, a: (n, d, 0, 0, 0)),
            scratch_shapes=[pltpu.VMEM((Ho * Wo, Ncp), jnp.float32)],
        ),
        compiler_params=pltpu.CompilerParams(
            dimension_semantics=("parallel", "parallel", "arbitrary"),
            vmem_limit_bytes=_vmem_limit_bytes(est)),
    )(xp, wk, scale_p, shift_p)


# ----------------- strided encoder convs (ec0/ec1): im2col + one matmul --------------

def _mm_bn_act_kernel(lhs_ref, rhs_ref, scale_ref, shift_ref, out_ref,
                      *, act, negative_slope):
    y = jnp.dot(lhs_ref[...], rhs_ref[...], preferred_element_type=jnp.float32)
    y = y * scale_ref[...] + shift_ref[...]
    out_ref[...] = _apply_act(y, act, negative_slope).astype(out_ref.dtype)


def im2col_3d(x, ksize, stride, dilation, padding, k_pad_to=128):
    """x (N,D,H,W,C) -> (N*Do*Ho*Wo, Kp); feature order (kd, kh, kw, Cin)."""
    kd, kh, kw = ksize
    sd, sh, sw = stride
    dd, dh, dw = dilation
    pd, ph, pw = padding
    N, D, H, W, C = x.shape
    Do = (D + 2 * pd - dd * (kd - 1) - 1) // sd + 1
    Ho = (H + 2 * ph - dh * (kh - 1) - 1) // sh + 1
    Wo = (W + 2 * pw - dw * (kw - 1) - 1) // sw + 1
    xp = jnp.pad(x, ((0, 0), (pd, pd), (ph, ph), (pw, pw), (0, 0)))
    cols = []
    for a in range(kd):
        for b in range(kh):
            for c in range(kw):
                cols.append(xp[:,
                               a * dd: a * dd + sd * (Do - 1) + 1: sd,
                               b * dh: b * dh + sh * (Ho - 1) + 1: sh,
                               c * dw: c * dw + sw * (Wo - 1) + 1: sw, :])
    K = kd * kh * kw * C
    Kp = _round_up(K, k_pad_to)
    if Kp > K:
        cols.append(jnp.zeros(cols[-1].shape[:-1] + (Kp - K,), x.dtype))
    patches = jnp.concatenate(cols, axis=-1)
    return patches.reshape(N * Do * Ho * Wo, Kp), K, (N, Do, Ho, Wo)


def conv3d_strided_bn_act(x, w, scale, shift, *, stride, dilation=(1, 1, 1),
                          padding=(1, 1, 1), act="none", negative_slope=0.2,
                          compute_dtype=jnp.bfloat16, out_dtype=None, tm=1024):
    """General (strided) Conv3d+BN+act via im2col + one Pallas matmul (small layers)."""
    kd, kh, kw, Cin, Cout = w.shape
    assert Cout <= 256
    out_dtype = compute_dtype if out_dtype is None else out_dtype
    patches, K, (N, Do, Ho, Wo) = im2col_3d(
        x.astype(compute_dtype), (kd, kh, kw), stride, dilation, padding)
    M, Kp = patches.shape
    wmat = w.astype(compute_dtype).reshape(K, Cout)
    if Kp > K:
        wmat = jnp.pad(wmat, ((0, Kp - K), (0, 0)))
    tm = min(tm, _round_up(M, 8))
    Mp = _round_up(M, tm)
    if Mp > M:
        patches = jnp.pad(patches, ((0, Mp - M), (0, 0)))
    scale2 = scale.astype(jnp.float32).reshape(1, Cout)
    shift2 = shift.astype(jnp.float32).reshape(1, Cout)

    csize = jnp.dtype(compute_dtype).itemsize
    est = (2 * tm * Kp * csize + 2 * Kp * Cout * csize
           + 2 * tm * Cout * jnp.dtype(out_dtype).itemsize
           + 2 * tm * Cout * 4 + (4 << 20))

    kernel = functools.partial(_mm_bn_act_kernel, act=act,
                               negative_slope=negative_slope)
    out = pl.pallas_call(
        kernel,
        out_shape=jax.ShapeDtypeStruct((Mp, Cout), out_dtype),
        grid_spec=pltpu.PrefetchScalarGridSpec(
            num_scalar_prefetch=0,
            grid=(Mp // tm,),
            in_specs=[
                pl.BlockSpec((tm, Kp), lambda i: (i, 0)),
                pl.BlockSpec((Kp, Cout), lambda i: (0, 0)),   # weight resident
                pl.BlockSpec((1, Cout), lambda i: (0, 0)),
                pl.BlockSpec((1, Cout), lambda i: (0, 0)),
            ],
            out_specs=pl.BlockSpec((tm, Cout), lambda i: (i, 0)),
        ),
        compiler_params=pltpu.CompilerParams(
            dimension_semantics=("parallel",),
            vmem_limit_bytes=_vmem_limit_bytes(est)),
    )(patches, wmat, scale2, shift2)
    return out[:M].reshape(N, Do, Ho, Wo, Cout)


# ------------------- exact-2x trilinear upsample (align_corners=False) ----------------
# For scale factor 2 with align_corners=False the interpolation weights are the
# static pair (0.25, 0.75): even output 2i = 0.25*x[i-1] + 0.75*x[i] (edge
# clamped), odd output 2i+1 = 0.75*x[i] + 0.25*x[i+1].  Depth blending picks two
# source slices via BlockSpec index maps; H is interleaved via a layout-free
# stack+reshape; W parity is packed into the lane dim (last dim 2*C) and the
# wrapper's row-major reshape (free) recovers (..., 2W, C).

def _upsample2x_kernel(*refs, depth2x):
    if depth2x:
        x0_ref, x1_ref, out_ref = refs
        j = pl.program_id(1)
        w_lo = jnp.where(j % 2 == 0, 0.25, 0.75).astype(x0_ref.dtype)
        x = w_lo * x0_ref[0, 0] + (1.0 - w_lo) * x1_ref[0, 0]
    else:
        x0_ref, out_ref = refs
        x = x0_ref[0, 0]
    Hi, Wi, C = x.shape
    dt = x.dtype
    c025 = jnp.array(0.25, dt)
    c075 = jnp.array(0.75, dt)
    # H 2x (layout-free interleave: stack on an outer axis, merge leading dims)
    ph = jnp.concatenate([x[:1], x[:-1]], axis=0)
    nh = jnp.concatenate([x[1:], x[-1:]], axis=0)
    eh = c025 * ph + c075 * x
    oh = c075 * x + c025 * nh
    xh = jnp.stack([eh, oh], axis=1).reshape(2 * Hi, Wi, C)
    # W 2x: parity packed into lanes; wrapper reshape interleaves for free
    pw = jnp.concatenate([xh[:, :1], xh[:, :-1]], axis=1)
    nw = jnp.concatenate([xh[:, 1:], xh[:, -1:]], axis=1)
    ew = c025 * pw + c075 * xh
    ow = c075 * xh + c025 * nw
    out_ref[0, 0, :, :, :C] = ew.astype(out_ref.dtype)
    out_ref[0, 0, :, :, C:] = ow.astype(out_ref.dtype)


def upsample2x(x, *, depth2x):
    """(N,D,H,W,C) -> (N, 2D if depth2x else D, 2H, 2W, C), PyTorch trilinear
    (align_corners=False) for exact factor-2 scaling, computed in x.dtype."""
    N, Din, Hi, Wi, C = x.shape
    Dout = 2 * Din if depth2x else Din
    isize = jnp.dtype(x.dtype).itemsize

    if depth2x:
        def lo_map(n, j):
            return (n, jnp.maximum(j // 2 - 1 + (j % 2), 0), 0, 0, 0)

        def hi_map(n, j):
            return (n, jnp.minimum(j // 2 + (j % 2), Din - 1), 0, 0, 0)

        in_specs = [pl.BlockSpec((1, 1, Hi, Wi, C), lo_map),
                    pl.BlockSpec((1, 1, Hi, Wi, C), hi_map)]
        operands = (x, x)
    else:
        in_specs = [pl.BlockSpec((1, 1, Hi, Wi, C), lambda n, j: (n, j, 0, 0, 0))]
        operands = (x,)

    est = (len(operands) * 2 * Hi * Wi * C * isize        # input blocks
           + 2 * 2 * Hi * Wi * 2 * C * isize              # output block
           + 10 * 2 * Hi * Wi * C * isize                 # in-kernel intermediates
           + (4 << 20))

    kernel = functools.partial(_upsample2x_kernel, depth2x=depth2x)
    out = pl.pallas_call(
        kernel,
        out_shape=jax.ShapeDtypeStruct((N, Dout, 2 * Hi, Wi, 2 * C), x.dtype),
        grid_spec=pltpu.PrefetchScalarGridSpec(
            num_scalar_prefetch=0,
            grid=(N, Dout),
            in_specs=in_specs,
            out_specs=pl.BlockSpec((1, 1, 2 * Hi, Wi, 2 * C),
                                   lambda n, j: (n, j, 0, 0, 0)),
        ),
        compiler_params=pltpu.CompilerParams(
            dimension_semantics=("parallel", "parallel"),
            vmem_limit_bytes=_vmem_limit_bytes(est)),
    )(*operands)
    # (N, Dout, 2Hi, Wi, 2C) -> (N, Dout, 2Hi, 2Wi, C): row-major bitcast reshape.
    return out.reshape(N, Dout, 2 * Hi, 2 * Wi, C)


# ----------------------------------- parameters --------------------------------------

def init_params(key):
    def conv_w(k, cin, cout):
        fan_in = 27 * cin
        return jax.random.normal(k, (3, 3, 3, cin, cout), jnp.float32) / jnp.sqrt(fan_in)

    def bn(k, c):
        k1, k2, k3, k4 = jax.random.split(k, 4)
        gamma = 1.0 + 0.1 * jax.random.normal(k1, (c,), jnp.float32)
        beta = 0.1 * jax.random.normal(k2, (c,), jnp.float32)
        mean = 0.1 * jax.random.normal(k3, (c,), jnp.float32)
        var = 1.0 + 0.1 * jax.random.uniform(k4, (c,), jnp.float32)
        scale = gamma / jnp.sqrt(var + 1e-5)     # inference-mode folded BN
        shift = beta - mean * scale
        return scale, shift

    cfg = [("ec0", 3, 64), ("ec1", 64, 128), ("bt0", 128, 256), ("bt1", 256, 256),
           ("bt2", 256, 256), ("bt3", 256, 256), ("dc1", 256, 128),
           ("dc0", 128 + 64, 64), ("clip_p", 64 + 3, 3)]
    params = {}
    for k, (name, cin, cout) in zip(jax.random.split(key, len(cfg)), cfg):
        kw_, kb_ = jax.random.split(k)
        w = conv_w(kw_, cin, cout)
        if name == "clip_p":
            scale = jnp.ones((cout,), jnp.float32)
            shift = jnp.zeros((cout,), jnp.float32)
        else:
            scale, shift = bn(kb_, cout)
        params[name] = (w, scale, shift)
    return params


# -------------------------------------- forward --------------------------------------

def icnet_residual3d_forward(x, params, *, compute_dtype=jnp.bfloat16):
    """x: (N, D, H, W, 3), NDHWC.

    The PyTorch module hard-codes the decoder upsample sizes to (4,64,64) and
    (8,128,128) for its intended (8,128,128) input; for any D%2==0, H%4==0,
    W%4==0 input those targets are exactly the 2x upsamples implemented here.
    """
    N, D, H, W, C = x.shape
    assert C == 3
    assert D % 2 == 0 and H % 4 == 0 and W % 4 == 0, \
        "spatial dims must be divisible by (2,4,4) (module targets 8x128x128)"
    x = x.astype(compute_dtype)
    cd = dict(compute_dtype=compute_dtype)
    e0 = conv3d_strided_bn_act(x, *params["ec0"], stride=(2, 2, 2), act="relu", **cd)
    e1 = conv3d_strided_bn_act(e0, *params["ec1"], stride=(1, 2, 2), act="relu", **cd)
    b0 = conv3d_same_bn_act(e1, *params["bt0"], act="relu", **cd)
    b1 = conv3d_same_bn_act(b0, *params["bt1"], dilation=(1, 2, 2), padding=(1, 2, 2),
                            act="relu", **cd)
    b2 = conv3d_same_bn_act(b1, *params["bt2"], dilation=(1, 4, 4), padding=(1, 4, 4),
                            act="relu", **cd)
    b3 = conv3d_same_bn_act(b2, *params["bt3"], dilation=(1, 8, 8), padding=(1, 8, 8),
                            act="relu", **cd)
    # dc1: Upsample(e0 spatial) -> Conv -> BN -> LeakyReLU(0.2)
    u1 = upsample2x(b3, depth2x=False)
    d1 = jnp.concatenate(
        [conv3d_same_bn_act(u1, *params["dc1"], act="leaky_relu", **cd), e0], axis=-1)
    # dc0: Upsample(x spatial) -> Conv -> BN -> LeakyReLU(0.2)
    u0 = upsample2x(d1, depth2x=True)
    d0 = jnp.concatenate(
        [conv3d_same_bn_act(u0, *params["dc0"], act="leaky_relu", **cd), x], axis=-1)
    clip = conv3d_same_bn_act(d0, *params["clip_p"], act="none",
                              compute_dtype=compute_dtype, out_dtype=jnp.float32)
    # TODO(synk): the reference forward uses undefined `self.scaledown` and `mask`;
    # the clamp branch and `mask` output have no defined semantics, so only `clip`
    # is returned.
    return clip


# --------------------------------- references / main -----------------------------------

def _reference_conv(x, w, scale, shift, stride, dilation, padding, act):
    out = jax.lax.conv_general_dilated(
        x, w, window_strides=stride, padding=[(p, p) for p in padding],
        rhs_dilation=dilation, dimension_numbers=("NDHWC", "DHWIO", "NDHWC"))
    out = out * scale + shift
    return _apply_act(out, act, 0.2)


def _linear_idx_weights(in_size, out_size):
    dst = jnp.arange(out_size, dtype=jnp.float32)
    src = (dst + 0.5) * (in_size / out_size) - 0.5   # PyTorch align_corners=False
    src = jnp.maximum(src, 0.0)
    i0 = jnp.minimum(jnp.floor(src).astype(jnp.int32), in_size - 1)
    i1 = jnp.minimum(i0 + 1, in_size - 1)
    w1 = src - i0.astype(jnp.float32)
    return i0, i1, w1


def _reference_upsample(x, size):
    for axis, outsz in zip((1, 2, 3), size):
        insz = x.shape[axis]
        if insz == outsz:
            continue
        i0, i1, w1 = _linear_idx_weights(insz, outsz)
        x0 = jnp.take(x, i0, axis=axis)
        x1 = jnp.take(x, i1, axis=axis)
        wshape = [1] * x.ndim
        wshape[axis] = outsz
        w1 = w1.reshape(wshape)
        x = x0 * (1.0 - w1) + x1 * w1
    return x


if __name__ == "__main__":
    key = jax.random.PRNGKey(0)
    kx, kp, k1, k2, k3, k4, k5 = jax.random.split(key, 7)

    # Sanity 1: stride-1 dilated tap-conv kernel vs lax.conv (f32 compute).
    xt = jax.random.normal(k1, (1, 3, 8, 8, 5), jnp.float32)
    wt = 0.1 * jax.random.normal(k2, (3, 3, 3, 5, 16), jnp.float32)
    st = jnp.linspace(0.5, 1.5, 16, dtype=jnp.float32)
    sh = jnp.linspace(-0.2, 0.2, 16, dtype=jnp.float32)
    got = conv3d_same_bn_act(xt, wt, st, sh, dilation=(1, 2, 2), padding=(1, 2, 2),
                             act="leaky_relu", compute_dtype=jnp.float32,
                             out_dtype=jnp.float32)
    want = _reference_conv(xt, wt, st, sh, (1, 1, 1), (1, 2, 2), (1, 2, 2), "leaky_relu")
    assert jnp.max(jnp.abs(got - want)) < 1e-3, "tap-conv sanity check failed"

    # Sanity 2: strided im2col conv kernel vs lax.conv (f32 compute).
    xt2 = jax.random.normal(k3, (1, 4, 8, 8, 3), jnp.float32)
    wt2 = 0.1 * jax.random.normal(k4, (3, 3, 3, 3, 16), jnp.float32)
    got2 = conv3d_strided_bn_act(xt2, wt2, st, sh, stride=(2, 2, 2), padding=(1, 1, 1),
                                 act="relu", compute_dtype=jnp.float32,
                                 out_dtype=jnp.float32)
    want2 = _reference_conv(xt2, wt2, st, sh, (2, 2, 2), (1, 1, 1), (1, 1, 1), "relu")
    assert jnp.max(jnp.abs(got2 - want2)) < 1e-3, "strided-conv sanity check failed"

    # Sanity 3: exact-2x Pallas upsample vs take-based trilinear reference (f32).
    xu = jax.random.normal(k5, (1, 2, 4, 8, 64), jnp.float32)
    up_d = upsample2x(xu, depth2x=True)
    ref_d = _reference_upsample(xu, (4, 8, 16))
    assert jnp.max(jnp.abs(up_d - ref_d)) < 1e-4, "2x upsample (depth2x) check failed"
    up_s = upsample2x(xu, depth2x=False)
    ref_s = _reference_upsample(xu, (2, 8, 16))
    assert jnp.max(jnp.abs(up_s - ref_s)) < 1e-4, "2x upsample check failed"

    # ICNetResidual3D forward at a small, stride-compatible shape.
    x_ncdhw = jax.random.normal(kx, (1, 3, 4, 32, 32), jnp.float32)   # PyTorch NCDHW
    x = jnp.transpose(x_ncdhw, (0, 2, 3, 4, 1))                       # -> NDHWC
    params = init_params(kp)

    clip = jax.jit(icnet_residual3d_forward)(x, params)
    jax.block_until_ready(clip)
    clip_ncdhw = jnp.transpose(clip, (0, 4, 1, 2, 3))
    assert clip_ncdhw.shape == (1, 3, 4, 32, 32)
    print("KERNEL_OK")
</pallas_src>

<mosaic_0001>
module attributes {stable_mosaic.version = 11 : i64} {
  func.func @_tap_conv_kernel(%arg0: i32, %arg1: i32, %arg2: i32, %arg3: memref<1x1x12x12x64xf32, #tpu.memory_space<vmem>>, %arg4: memref<3x576x128xf32, #tpu.memory_space<vmem>>, %arg5: memref<1x128xf32, #tpu.memory_space<vmem>>, %arg6: memref<1x128xf32, #tpu.memory_space<vmem>>, %arg7: memref<1x1x8x8x16xf32, #tpu.memory_space<vmem>>, %arg8: memref<64x128xf32, #tpu.memory_space<vmem>>) attributes {dimension_semantics = [#tpu.dimension_semantics<parallel>, #tpu.dimension_semantics<parallel>, #tpu.dimension_semantics<arbitrary>], iteration_bounds = array<i64: 1, 3, 3>, scalar_prefetch = 0 : i64, scratch_operands = 1 : i64, tpu.core_type = #tpu.core_type<tc>, window_params = [{transform_indices = @transform_0, window_bounds = array<i64: 1, 1, 12, 12, 64>}, {pipeline_mode = #tpu.pipeline_mode<synchronous>, transform_indices = @transform_1, window_bounds = array<i64: 3, 576, 128>}, {pipeline_mode = #tpu.pipeline_mode<synchronous>, transform_indices = @transform_2, window_bounds = array<i64: 1, 128>}, {pipeline_mode = #tpu.pipeline_mode<synchronous>, transform_indices = @transform_3, window_bounds = array<i64: 1, 128>}, {transform_indices = @transform_4, window_bounds = array<i64: 1, 1, 8, 8, 16>}]} {
    %0 = arith.index_cast %arg2 : i32 to index
    %c0 = arith.constant 0 : index
    %c0_0 = arith.constant 0 : index
    %1 = vector.load %arg4[%0, %c0, %c0_0] : memref<3x576x128xf32, #tpu.memory_space<vmem>>, vector<1x576x128xf32>
    %2 = vector.shape_cast %1 : vector<1x576x128xf32> to vector<576x128xf32>
    %c0_1 = arith.constant 0 : index
    %c0_2 = arith.constant 0 : index
    %c0_3 = arith.constant 0 : index
    %c0_4 = arith.constant 0 : index
    %c0_5 = arith.constant 0 : index
    %3 = vector.load %arg3[%c0_1, %c0_2, %c0_3, %c0_4, %c0_5] : memref<1x1x12x12x64xf32, #tpu.memory_space<vmem>>, vector<1x1x8x8x64xf32>
    %4 = vector.shape_cast %3 : vector<1x1x8x8x64xf32> to vector<8x8x64xf32>
    %5 = vector.shape_cast %4 : vector<8x8x64xf32> to vector<64x64xf32>
    %c0_6 = arith.constant 0 : index
    %c0_7 = arith.constant 0 : index
    %c0_8 = arith.constant 0 : index
    %c2 = arith.constant 2 : index
    %c0_9 = arith.constant 0 : index
    %6 = vector.load %arg3[%c0_6, %c0_7, %c0_8, %c2, %c0_9] : memref<1x1x12x12x64xf32, #tpu.memory_space<vmem>>, vector<1x1x8x8x64xf32>
    %7 = vector.shape_cast %6 : vector<1x1x8x8x64xf32> to vector<8x8x64xf32>
    %8 = vector.shape_cast %7 : vector<8x8x64xf32> to vector<64x64xf32>
    %c0_10 = arith.constant 0 : index
    %c0_11 = arith.constant 0 : index
    %c0_12 = arith.constant 0 : index
    %c4 = arith.constant 4 : index
    %c0_13 = arith.constant 0 : index
    %9 = vector.load %arg3[%c0_10, %c0_11, %c0_12, %c4, %c0_13] : memref<1x1x12x12x64xf32, #tpu.memory_space<vmem>>, vector<1x1x8x8x64xf32>
    %10 = vector.shape_cast %9 : vector<1x1x8x8x64xf32> to vector<8x8x64xf32>
    %11 = vector.shape_cast %10 : vector<8x8x64xf32> to vector<64x64xf32>
    %c0_14 = arith.constant 0 : index
    %c0_15 = arith.constant 0 : index
    %c2_16 = arith.constant 2 : index
    %c0_17 = arith.constant 0 : index
    %c0_18 = arith.constant 0 : index
    %12 = vector.load %arg3[%c0_14, %c0_15, %c2_16, %c0_17, %c0_18] : memref<1x1x12x12x64xf32, #tpu.memory_space<vmem>>, vector<1x1x8x8x64xf32>
    %13 = vector.shape_cast %12 : vector<1x1x8x8x64xf32> to vector<8x8x64xf32>
    %14 = vector.shape_cast %13 : vector<8x8x64xf32> to vector<64x64xf32>
    %c0_19 = arith.constant 0 : index
    %c0_20 = arith.constant 0 : index
    %c2_21 = arith.constant 2 : index
    %c2_22 = arith.constant 2 : index
    %c0_23 = arith.constant 0 : index
    %15 = vector.load %arg3[%c0_19, %c0_20, %c2_21, %c2_22, %c0_23] : memref<1x1x12x12x64xf32, #tpu.memory_space<vmem>>, vector<1x1x8x8x64xf32>
    %16 = vector.shape_cast %15 : vector<1x1x8x8x64xf32> to vector<8x8x64xf32>
    %17 = vector.shape_cast %16 : vector<8x8x64xf32> to vector<64x64xf32>
    %c0_24 = arith.constant 0 : index
    %c0_25 = arith.constant 0 : index
    %c2_26 = arith.constant 2 : index
    %c4_27 = arith.constant 4 : index
    %c0_28 = arith.constant 0 : index
    %18 = vector.load %arg3[%c0_24, %c0_25, %c2_26, %c4_27, %c0_28] : memref<1x1x12x12x64xf32, #tpu.memory_space<vmem>>, vector<1x1x8x8x64xf32>
    %19 = vector.shape_cast %18 : vector<1x1x8x8x64xf32> to vector<8x8x64xf32>
    %20 = vector.shape_cast %19 : vector<8x8x64xf32> to vector<64x64xf32>
    %c0_29 = arith.constant 0 : index
    %c0_30 = arith.constant 0 : index
    %c4_31 = arith.constant 4 : index
    %c0_32 = arith.constant 0 : index
    %c0_33 = arith.constant 0 : index
    %21 = vector.load %arg3[%c0_29, %c0_30, %c4_31, %c0_32, %c0_33] : memref<1x1x12x12x64xf32, #tpu.memory_space<vmem>>, vector<1x1x8x8x64xf32>
    %22 = vector.shape_cast %21 : vector<1x1x8x8x64xf32> to vector<8x8x64xf32>
    %23 = vector.shape_cast %22 : vector<8x8x64xf32> to vector<64x64xf32>
    %c0_34 = arith.constant 0 : index
    %c0_35 = arith.constant 0 : index
    %c4_36 = arith.constant 4 : index
    %c2_37 = arith.constant 2 : index
    %c0_38 = arith.constant 0 : index
    %24 = vector.load %arg3[%c0_34, %c0_35, %c4_36, %c2_37, %c0_38] : memref<1x1x12x12x64xf32, #tpu.memory_space<vmem>>, vector<1x1x8x8x64xf32>
    %25 = vector.shape_cast %24 : vector<1x1x8x8x64xf32> to vector<8x8x64xf32>
    %26 = vector.shape_cast %25 : vector<8x8x64xf32> to vector<64x64xf32>
    %c0_39 = arith.constant 0 : index
    %c0_40 = arith.constant 0 : index
    %c4_41 = arith.constant 4 : index
    %c4_42 = arith.constant 4 : index
    %c0_43 = arith.constant 0 : index
    %27 = vector.load %arg3[%c0_39, %c0_40, %c4_41, %c4_42, %c0_43] : memref<1x1x12x12x64xf32, #tpu.memory_space<vmem>>, vector<1x1x8x8x64xf32>
    %28 = vector.shape_cast %27 : vector<1x1x8x8x64xf32> to vector<8x8x64xf32>
    %29 = vector.shape_cast %28 : vector<8x8x64xf32> to vector<64x64xf32>
    %30 = tpu.concatenate %5, %8, %11, %14, %17, %20, %23, %26, %29 in 1 : vector<64x64xf32>, vector<64x64xf32>, vector<64x64xf32>, vector<64x64xf32>, vector<64x64xf32>, vector<64x64xf32>, vector<64x64xf32>, vector<64x64xf32>, vector<64x64xf32> -> vector<64x576xf32>
    %cst = arith.constant dense<0.000000e+00> : vector<64x128xf32>
    %31 = tpu.matmul %30, %2, %cst {dimension_numbers = #tpu.dot_dimension_numbers<[1], [0], [0], [1], [0, 0, 1, 1], [], []>} : vector<64x576xf32>, vector<576x128xf32>, vector<64x128xf32> -> vector<64x128xf32>
    %c0_i32 = arith.constant 0 : i32
    %32 = arith.cmpi eq, %arg2, %c0_i32 : i32
    %33 = arith.extui %32 : i1 to i32
    %c0_i32_44 = arith.constant 0 : i32
    %34 = arith.cmpi ne, %33, %c0_i32_44 : i32
    scf.if %34 {
      %c0_48 = arith.constant 0 : index
      %c0_49 = arith.constant 0 : index
      %41 = vector.load %arg8[%c0_48, %c0_49] : memref<64x128xf32, #tpu.memory_space<vmem>>, vector<64x128xf32>
      tpu.vector_store %arg8[%c0_48, %c0_49], %31 {strides = array<i32>} : memref<64x128xf32, #tpu.memory_space<vmem>>, vector<64x128xf32>,
    } else {
    }
    %c0_i32_45 = arith.constant 0 : i32
    %35 = arith.cmpi sgt, %arg2, %c0_i32_45 : i32
    %36 = arith.extui %35 : i1 to i32
    %c0_i32_46 = arith.constant 0 : i32
    %37 = arith.cmpi ne, %36, %c0_i32_46 : i32
    scf.if %37 {
      %c0_48 = arith.constant 0 : index
      %c0_49 = arith.constant 0 : index
      %41 = vector.load %arg8[%c0_48, %c0_49] : memref<64x128xf32, #tpu.memory_space<vmem>>, vector<64x128xf32>
      %42 = arith.addf %41, %31 : vector<64x128xf32>
      %c0_50 = arith.constant 0 : index
      %c0_51 = arith.constant 0 : index
      %43 = vector.load %arg8[%c0_50, %c0_51] : memref<64x128xf32, #tpu.memory_space<vmem>>, vector<64x128xf32>
      tpu.vector_store %arg8[%c0_50, %c0_51], %42 {strides = array<i32>} : memref<64x128xf32, #tpu.memory_space<vmem>>, vector<64x128xf32>,
    } else {
    }
    %c2_i32 = arith.constant 2 : i32
    %38 = arith.cmpi eq, %arg2, %c2_i32 : i32
    %39 = arith.extui %38 : i1 to i32
    %c0_i32_47 = arith.constant 0 : i32
    %40 = arith.cmpi ne, %39, %c0_i32_47 : i32
    scf.if %40 {
      %c0_48 = arith.constant 0 : index
      %c0_49 = arith.constant 0 : index
      %41 = vector.load %arg8[%c0_48, %c0_49] : memref<64x128xf32, #tpu.memory_space<vmem>>, vector<64x128xf32>
      %c0_50 = arith.constant 0 : index
      %c0_51 = arith.constant 0 : index
      %42 = vector.load %arg5[%c0_50, %c0_51] : memref<1x128xf32, #tpu.memory_space<vmem>>, vector<1x128xf32>
      %43 = vector.broadcast %42 : vector<1x128xf32> to vector<64x128xf32>
      %44 = arith.mulf %41, %43 : vector<64x128xf32>
      %c0_52 = arith.constant 0 : index
      %c0_53 = arith.constant 0 : index
      %45 = vector.load %arg6[%c0_52, %c0_53] : memref<1x128xf32, #tpu.memory_space<vmem>>, vector<1x128xf32>
      %46 = vector.broadcast %45 : vector<1x128xf32> to vector<64x128xf32>
      %47 = arith.addf %44, %46 : vector<64x128xf32>
      %cst_54 = arith.constant 0.000000e+00 : f32
      %48 = vector.broadcast %cst_54 : f32 to vector<64x128xf32>
      %49 = arith.cmpf oge, %47, %48 : vector<64x128xf32>
      %cst_55 = arith.constant 2.000000e-01 : f32
      %50 = vector.broadcast %cst_55 : f32 to vector<64x128xf32>
      %51 = arith.mulf %50, %47 : vector<64x128xf32>
      %52 = arith.select %49, %47, %51 : vector<64x128xi1>, vector<64x128xf32>
      %53 = vector.shape_cast %52 : vector<64x128xf32> to vector<1x1x8x8x128xf32>
      %54 = vector.extract_strided_slice %53 {offsets = [0, 0, 0, 0, 0], sizes = [1, 1, 8, 8, 16], strides = [1, 1, 1, 1, 1]} : vector<1x1x8x8x128xf32> to vector<1x1x8x8x16xf32>
      %c0_56 = arith.constant 0 : index
      %c0_57 = arith.constant 0 : index
      %c0_58 = arith.constant 0 : index
      %c0_59 = arith.constant 0 : index
      %c0_60 = arith.constant 0 : index
      %55 = vector.load %arg7[%c0_56, %c0_57, %c0_58, %c0_59, %c0_60] : memref<1x1x8x8x16xf32, #tpu.memory_space<vmem>>, vector<1x1x8x8x16xf32>
      tpu.vector_store %arg7[%c0_56, %c0_57, %c0_58, %c0_59, %c0_60], %54 {strides = array<i32>} : memref<1x1x8x8x16xf32, #tpu.memory_space<vmem>>, vector<1x1x8x8x16xf32>,
    } else {
    }
    return
  }
  func.func @transform_0(%arg0: i32, %arg1: i32, %arg2: i32) -> (i32, i32, i32, i32, i32) {
    %0 = arith.addi %arg1, %arg2 : i32
    %c0_i32 = arith.constant 0 : i32
    %c0_i32_0 = arith.constant 0 : i32
    %c0_i32_1 = arith.constant 0 : i32
    %c0_i32_2 = arith.constant 0 : i32
    return %arg0, %0, %c0_i32, %c0_i32_0, %c0_i32_1 : i32, i32, i32, i32, i32
  }
  func.func @transform_1(%arg0: i32, %arg1: i32, %arg2: i32) -> (i32, i32, i32) {
    %c0_i32 = arith.constant 0 : i32
    %c0_i32_0 = arith.constant 0 : i32
    %c0_i32_1 = arith.constant 0 : i32
    %c0_i32_2 = arith.constant 0 : i32
    return %c0_i32, %c0_i32_0, %c0_i32_1 : i32, i32, i32
  }
  func.func @transform_2(%arg0: i32, %arg1: i32, %arg2: i32) -> (i32, i32) {
    %c0_i32 = arith.constant 0 : i32
    %c0_i32_0 = arith.constant 0 : i32
    %c0_i32_1 = arith.constant 0 : i32
    return %c0_i32, %c0_i32_0 : i32, i32
  }
  func.func @transform_3(%arg0: i32, %arg1: i32, %arg2: i32) -> (i32, i32) {
    %c0_i32 = arith.constant 0 : i32
    %c0_i32_0 = arith.constant 0 : i32
    %c0_i32_1 = arith.constant 0 : i32
    return %c0_i32, %c0_i32_0 : i32, i32
  }
  func.func @transform_4(%arg0: i32, %arg1: i32, %arg2: i32) -> (i32, i32, i32, i32, i32) {
    %c0_i32 = arith.constant 0 : i32
    %c0_i32_0 = arith.constant 0 : i32
    %c0_i32_1 = arith.constant 0 : i32
    %c0_i32_2 = arith.constant 0 : i32
    return %arg0, %arg1, %c0_i32, %c0_i32_0, %c0_i32_1 : i32, i32, i32, i32, i32
  }
}

</mosaic_0001>

<bundles_post_ra>
// kernel: tpu_custom_call.1
= control target key start
LH: loop header
LB: loop body
LE: loop exit
PB: predicated region body
PF: predicated region fallthrough
CT: control target
= control target key end

     0   :  { %9 = vsyncpa [#allocation4], 0  ;;  %s2267_s0 = inlined_call_operand.vmem [shape: f32[1,5,12,12,64], index: 0, kind: input, shape index: {}]   ;;  %s2268_s1 = inlined_call_operand.hbm [shape: f32[3,576,128], index: 1, kind: input, shape index: {}]   ;;  %s2269_s2 = inlined_call_operand.vmem [shape: f32[1,128], index: 2, kind: input, shape index: {}]   ;;  %s2270_s3 = inlined_call_operand.vmem [shape: f32[1,128], index: 3, kind: input, shape index: {}]   ;;  %s2271_s4 = inlined_call_operand.hbm [shape: f32[1,3,8,8,16], index: 4, kind: output, shape index: {}]  }
   0x1   :  { %10 = vsyncpa [#allocation5], 0 }
   0x2   :  { %12 = vsyncpa [#allocation5 + $0x1], 0  ;;  %s1782_s15 = smov 0   ;;  %s1784_s16 = smov 0  }
   0x3   :  { %s1786_s17 = smov 0   ;;  %s1788_s18 = smov 0  }
   0x4   :  { %s1790_s19 = smov 0   ;;  %s1792_s20 = smov 0  }
   0x5   :  { %s1794_s21 = smov 0   ;;  %s1796_s22 = smov 0  }
   0x6 LB: > { %s1134_s23 = sadd.s32 4294967295, %s1748_s22   ;;  %s1135_s24 = sadd.s32 4294967294, %s1748_s22   ;;  %s1748_s22 = sphi %s1796_s22, %s18_s22   ;;  %s1744_s21 = sphi %s1794_s21, %s2291_s21   ;;  %s1740_s20 = sphi %s1792_s20, %s2290_s20   ;;  %s1736_s19 = sphi %s1790_s19, %s2289_s19   ;;  %s1732_s18 = sphi %s1788_s18, %s2288_s18   ;;  %s1728_s17 = sphi %s1786_s17, %s2287_s17   ;;  %s1724_s16 = sphi %s1784_s16, %s2286_s16   ;;  %s1720_s15 = sphi %s1782_s15, %s2285_s15  }
   0x7   : > { %s30_s25 = sadd.s32 1, %s1740_s20  ;;  %s33_s26 = sadd.s32 1, %s1744_s21 }
   0x8   : > { %p31_p0 = scmp.ge.s32.totalorder %s30_s25, 3  ;;  %s139_s27 = sadd.s32 1, %s1728_s17 }
   0x9   : > { %p149_p1 = scmp.ne.s32.totalorder %s1728_s17, %s1724_s16  ;;  %p150_p2 = scmp.eq.s32.totalorder %s1134_s23, 8 }
   0xa   : > { %s2293_s25 = smov (%p31_p0, %s30_s25), 0  ;;  %s2295_s26 = smov (!%p31_p0, %s33_s26), %s1744_s21 }
   0xb   : > { %p1832_p3 = por %p150_p2, %p149_p1  ;;  %p155_p4 = scmp.ne.s32.totalorder %s1724_s16, %s1720_s15 }
   0xc   : > { %p35_p5 = scmp.ge.s32.totalorder %s2295_s26, 3  ;;  %p156_p6 = scmp.eq.s32.totalorder %s1135_s24, 8 }
   0xd   : > { %s2276_s28 = scalar_select %p1832_p3, 1, 0 }
   0xe   : > { %p1136_p7 = scmp.ge.s32.totalorder %s1748_s22, 1  ;;  %p163_p8 = scmp.lt.s32.totalorder %s1748_s22, 10 }
   0xf   : > { %s2297_s26 = smov (%p35_p5, %s2295_s26), 0  ;;  %p1842_p9 = por %p156_p6, %p155_p4 }
  0x10   : > { %p1846_p10 = pnand %p1136_p7, %p163_p8  ;;  %s135_s5 = ssub.s32 %s1744_s21, %s2297_s26 }
  0x11   : > { %s2277_s29 = scalar_select %p1842_p9, 1, 0 }
  0x12   : > { %s2278_s30 = scalar_select %p1846_p10, 1, 0 }
  0x13   : > { %p137_p11 = scmp.eq.s32.totalorder %s135_s5, 0  ;;  %p1461_p12 = pneg %p1846_p10 }
  0x14   : > { %p1854_p13 = scmp.eq.s32.totalorder %s1134_s23, 0  ;;  %s1750_s8 = smov [#allocation3]  }
  0x15   : > { %s1859_s7 = scalar_select %p137_p11, %s1728_s17, %s139_s27  }
  0x16   : > { %s2279_s6 = scalar_select %p1854_p13, 1, 0 }
  0x17   : > { %s175_s9 = sshll.u32 %s1750_s8, 4  ;;  %p1863_p0 = pnand %p1854_p13, %p1461_p12  ;;  %s176_s9 = int_to_ptr.vmem [resolvable:$true] %s175_s9 }
  0x18   : > { %s1622_s13 = scalar_lea.hbm %s2268_s1, 27648 }
  0x19   : > { %p1623_p1 = scmp.ne.s32.totalorder %s2268_s1, %s1622_s13  ;;  %p1624_p2 = pneg %p1863_p0 }
  0x1a   : > { %p1629_p6 = scmp.lt.u32.totalorder %s1622_s13, %s2268_s1 }
  0x1b   : > { %p1625_p4 = pnand %p1624_p2, %p1623_p1 }
  0x1d   : > { %p1626_p5 = pneg %p1625_p4 }
  0x1f   : > { %p1631_p7 = pnand %p1629_p6, %p1626_p5 }
  0x21   : > { %1634 = shalt.err (!%p1631_p7)
}
  0x22   : > { %s1635_s5 = scalar_lea.vmem %s176_s9, 27648  ;;  %p1643_p9 = scmp.lt.s32.totalorder %s176_s9, %s176_s9 }
  0x23   : > { %p1636_p8 = scmp.ne.s32.totalorder %s176_s9, %s1635_s5  ;;  %p1644_p3 = scmp.lt.s32.totalorder %s1635_s5, %s1635_s5 }
  0x25   : > { %p1638_p11 = pnand %p1636_p8, %p1624_p2  ;;  %p1645_p13 = por %p1644_p3, %p1643_p9 }
  0x27   : > { %p1639_p12 = pneg %p1638_p11 }
  0x29   : > { %p1646_p10 = pnand %p1645_p13, %p1639_p12 }
  0x2b   : > { %1649 = shalt.err (!%p1646_p10)
}
  0x2c   : > { %s1751_s8 = smov 128   ;;  %s1752_s11 = smov 8  }
  0x2d   : > { %1464 = dma.hbm_to_vmem [thread:$0]  (!%p1863_p0), %s2268_s1, 27648, %s176_s9, [#allocation4], %s1751_s8, %s1751_s8, %s1752_s11  }
  0x2e   : > { %p2281_p1 = scmp.ne.s32.totalorder %s2278_s30, 0 }
  0x2f   : > { %p2282_p4 = scmp.ne.s32.totalorder (!%p2281_p1), %s2279_s6, 0 }
  0x30   : > { %211 = sbr.rel (%p2281_p1) target bundleno = 498 (0x1f2), region = 36 }
  0x37   : > { %1711 = dma.done.wait (%p2282_p4), [#allocation4], 27648  }
  0x38   : > { %1713 = vsyncadd (%p2282_p4), [#allocation4], 4294939648  ;;  %s242_s13 = sadd.s32 %s1732_s18, %s1736_s19  ;;  %s239_s10 = sand.u32 1, %s1724_s16   ;;  %vm529_vm0 = vcmask 523264  }
  0x39   : > { %p245_p3 = scmp.lt.s32.totalorder %s242_s13, 4  ;;  %s1894_s23 = sshll.u32 %s239_s10, 6 }
  0x3a   : > { %s253_s9 = smul.u32 576, %s1732_s18  ;;  %s1753_s8 = smov 64  }
  0x3b   : > { %s2299_s13 = smov (!%p245_p3, %s242_s13), 4  ;;  %s2177_s11 = scalar_lea.vmem [#allocation6], %s1894_s23 }
  0x3c   : > { %s1454_s30 = smul.u32 192, %s2299_s13  ;;  %s1902_s6 = scalar_lea.vmem [#allocation3], %s253_s9 }
  0x3d   : > { %v271_v0 = vld [vmem:[%s1902_s6 + $0x80] sm:$0xff]  ;;  %v272_v1 = vld [vmem:[%s1902_s6 + $0x88] sm:$0xff]  ;;  %v273_v38 = vld [vmem:[%s1902_s6 + $0x90] sm:$0xff]  ;;  %p1199_p9 = scmp.ne.s32.totalorder %s1732_s18, 0 }
  0x3e   : > { %s1900_s5 = scalar_lea.vmem %s2267_s0, %s1454_s30  ;;  %v1366_v5 = vpack.c.bf16 %v272_v1, %v271_v0  ;;  %v303_v20 = vld [vmem:[%s1902_s6 + $0x180] sm:$0xff]  ;;  %v304_v26 = vld [vmem:[%s1902_s6 + $0x188] sm:$0xff]  ;;  %v274_v39 = vld [vmem:[%s1902_s6 + $0x98] sm:$0xff] }
  0x3f   : > { %v1907_v2 = vld [vmem:[%s1900_s5 + $0x20] sm:$0xff]  ;;  %v1913_v4 = vld [vmem:[%s1900_s5 + $0x30] sm:$0xff]  ;;  %v1398_v30 = vpack.c.bf16 %v304_v26, %v303_v20  ;;  %v256_v31 = vld [vmem:[%s1902_s6 + $0x8] sm:$0xff]  ;;  %v1370_v42 = vpack.c.bf16 %v274_v39, %v273_v38 }
  0x40   : > { %v1910_v3 = vld [vmem:[%s1900_s5 + $0x42] sm:$0xff]  ;;  %v1918_v7 = vld [vmem:[%s1900_s5 + $0x52] sm:$0xff]  ;;  %1367 = vmatprep.subr.bf16.mxu0 %v1366_v5 }
  0x41   : > { %v1542_v6 = vpack.i.bf16 %v1910_v3, %v1907_v2  ;;  %v335_v8 = vld [vmem:[%s1900_s5 + $0x2] sm:$0xff]  ;;  %v1552_v10 = vpack.i.bf16 %v1918_v7, %v1913_v4  ;;  %v336_v11 = vld [vmem:[%s1900_s5 + $0x12] sm:$0xff]  ;;  %1399 = vmatprep.subr.bf16.mxu1 %v1398_v30 }
  0x42   : > { %v1922_v9 = vld [vmem:[%s1900_s5 + $0x24] sm:$0xff]  ;;  %v1928_v12 = vld [vmem:[%s1900_s5 + $0x34] sm:$0xff] }
  0x43   : > { %1543 = vrot.lane.b32.xlu0 %v1542_v6, %s1753_s8  ;;  %v1547_v13 = vpack.i.bf16 %v1922_v9, %v335_v8  ;;  %1553 = vrot.lane.b32.xlu1 %v1552_v10, %s1753_s8  ;;  %v1557_v14 = vpack.i.bf16 %v1928_v12, %v336_v11  ;;  %v1935_v15 = vld [vmem:[%s1900_s5 + $0x40] sm:$0xff]  ;;  %v1954_v22 = vld [vmem:[%s1900_s5 + $0x50] sm:$0xff] }
  0x44   : > { %v1938_v16 = vld [vmem:[%s1900_s5 + $0x62] sm:$0xff]  ;;  %v1957_v23 = vld [vmem:[%s1900_s5 + $0x72] sm:$0xff] }
  0x45   : > { %v1941_v17 = vld [vmem:[%s1900_s5 + $0x22] sm:$0xff]  ;;  %v1562_v19 = vpack.i.bf16 %v1938_v16, %v1935_v15  ;;  %v1960_v24 = vld [vmem:[%s1900_s5 + $0x32] sm:$0xff]  ;;  %v1572_v34 = vpack.i.bf16 %v1957_v23, %v1954_v22 }
  0x46   : > { %v1944_v18 = vld [vmem:[%s1900_s5 + $0x44] sm:$0xff]  ;;  %v1963_v25 = vld [vmem:[%s1900_s5 + $0x54] sm:$0xff] }
  0x47   : > { %1548 = vrot.lane.b32.xlu0 %v1547_v13, %s1753_s8  ;;  %1558 = vrot.lane.b32.xlu1 %v1557_v14, %s1753_s8  ;;  %v1567_v21 = vpack.i.bf16 %v1944_v18, %v1941_v17  ;;  %v255_v27 = vld [vmem:[%s1902_s6] sm:$0xff]  ;;  %v288_v33 = vld [vmem:[%s1902_s6 + $0x108] sm:$0xff]  ;;  %v1577_v41 = vpack.i.bf16 %v1963_v25, %v1960_v24 }
  0x48   : > { %v1968_v28 = vld [vmem:[%s1900_s5 + $0x60] sm:$0xff]  ;;  %v1368_v36 = vpack.c.bf16 %v256_v31, %v255_v27  ;;  %v305_v40 = vld [vmem:[%s1902_s6 + $0x190] sm:$0xff]  ;;  %v306_v43 = vld [vmem:[%s1902_s6 + $0x198] sm:$0xff] }
  0x49   : > { %v1971_v29 = vld [vmem:[%s1900_s5 + $0x82] sm:$0xff]  ;;  %v257_v44 = vld [vmem:[%s1902_s6 + $0x10] sm:$0xff]  ;;  %v258_v45 = vld [vmem:[%s1902_s6 + $0x18] sm:$0xff]  ;;  %v1402_v46 = vpack.c.bf16 %v306_v43, %v305_v40 }
  0x4a   : > { %v287_v32 = vld [vmem:[%s1902_s6 + $0x100] sm:$0xff]  ;;  %1369 = vmatpush3.bf16.msra.mxu0 %v1368_v36  ;;  %v1372_v47 = vpack.c.bf16 %v258_v45, %v257_v44  ;;  %v289_v48 = vld [vmem:[%s1902_s6 + $0x110] sm:$0xff]  ;;  %v290_v49 = vld [vmem:[%s1902_s6 + $0x118] sm:$0xff]  ;;  %v1582_v57 = vpack.i.bf16 %v1971_v29, %v1968_v28 }
  0x4b   : > { %1563 = vrot.lane.b32.xlu0 %v1562_v19, %s1753_s8  ;;  %v1980_v35 = vld [vmem:[%s1900_s5 + $0x64] sm:$0xff]  ;;  %v1400_v37 = vpack.c.bf16 %v288_v33, %v287_v32  ;;  %1568 = vrot.lane.b32.xlu1 %v1567_v21, %s1753_s8  ;;  %v1995_v51 = vld [vmem:[%s1900_s5 + $0x70] sm:$0xff]  ;;  %v1404_v53 = vpack.c.bf16 %v290_v49, %v289_v48 }
  0x4c   : > { %v275_v50 = vld [vmem:[%s1902_s6 + $0xa0] sm:$0xff]  ;;  %v1998_v52 = vld [vmem:[%s1900_s5 + $0x92] sm:$0xff]  ;;  %1371 = vmatprep.subr.bf16.mxu0 %v1370_v42  ;;  %v276_v54 = vld [vmem:[%s1902_s6 + $0xa8] sm:$0xff]  ;;  %v1587_v0 = vpack.i.bf16 %v1980_v35, %v1910_v3 }
  0x4d   : > { %1401 = vmatpush3.bf16.msra.mxu1 %v1400_v37  ;;  %v307_v55 = vld [vmem:[%s1902_s6 + $0x1a0] sm:$0xff]  ;;  %v308_v56 = vld [vmem:[%s1902_s6 + $0x1a8] sm:$0xff]  ;;  %v2007_v58 = vld [vmem:[%s1900_s5 + $0x74] sm:$0xff]  ;;  %v1374_v59 = vpack.c.bf16 %v276_v54, %v275_v50  ;;  %v1592_v30 = vpack.i.bf16 %v1998_v52, %v1995_v51 }
  0x4e   : > { %1403 = vmatprep.subr.bf16.mxu1 %v1402_v46  ;;  %v1406_v60 = vpack.c.bf16 %v308_v56, %v307_v55  ;;  %v259_v61 = vld [vmem:[%s1902_s6 + $0x20] sm:$0xff]  ;;  %v260_v62 = vld [vmem:[%s1902_s6 + $0x28] sm:$0xff]  ;;  %v277_v5 = vld [vmem:[%s1902_s6 + $0xb0] sm:$0xff]  ;;  %1373 = vmatpush3.bf16.msra.mxu0 %v1372_v47 }
  0x4f   : > { %1573 = vrot.lane.b32.xlu0 %v1572_v34, %s1753_s8  ;;  %v291_v63 = vld [vmem:[%s1902_s6 + $0x120] sm:$0xff]  ;;  %1578 = vrot.lane.b32.xlu1 %v1577_v41, %s1753_s8  ;;  %v292_v1 = vld [vmem:[%s1902_s6 + $0x128] sm:$0xff]  ;;  %v1376_v8 = vpack.c.bf16 %v260_v62, %v259_v61  ;;  %v1597_v34 = vpack.i.bf16 %v2007_v58, %v1918_v7 }
  0x50   : > { %v278_v6 = vld [vmem:[%s1902_s6 + $0xb8] sm:$0xff]  ;;  %v1408_v10 = vpack.c.bf16 %v292_v1, %v291_v63  ;;  %v309_v11 = vld [vmem:[%s1902_s6 + $0x1b0] sm:$0xff]  ;;  %1375 = vmatprep.subr.bf16.mxu0 %v1374_v59  ;;  %v279_v31 = vld [vmem:[%s1902_s6 + $0xc0] sm:$0xff] }
  0x51   : > { %1405 = vmatpush3.bf16.msra.mxu1 %v1404_v53  ;;  %v310_v13 = vld [vmem:[%s1902_s6 + $0x1b8] sm:$0xff]  ;;  %v261_v14 = vld [vmem:[%s1902_s6 + $0x30] sm:$0xff]  ;;  %v1378_v19 = vpack.c.bf16 %v278_v6, %v277_v5  ;;  %v280_v32 = vld [vmem:[%s1902_s6 + $0xc8] sm:$0xff] }
  0x52   : > { %1407 = vmatprep.subr.bf16.mxu1 %v1406_v60  ;;  %v1410_v20 = vpack.c.bf16 %v310_v13, %v309_v11  ;;  %v262_v21 = vld [vmem:[%s1902_s6 + $0x38] sm:$0xff]  ;;  %v293_v26 = vld [vmem:[%s1902_s6 + $0x130] sm:$0xff]  ;;  %v311_v33 = vld [vmem:[%s1902_s6 + $0x1c0] sm:$0xff]  ;;  %1377 = vmatpush3.bf16.msra.mxu0 %v1376_v8  ;;  %v1382_v44 = vpack.c.bf16 %v280_v32, %v279_v31 }
  0x53   : > { %v294_v27 = vld [vmem:[%s1902_s6 + $0x138] sm:$0xff]  ;;  %1583 = vrot.lane.b32.xlu0 %v1582_v57, %s1753_s8  ;;  %1588 = vrot.lane.b32.xlu1 %v1587_v0, %s1753_s8  ;;  %v2034_v36 = vld [vmem:[%s1900_s5 + $0x80] sm:$0xff]  ;;  %v1380_v40 = vpack.c.bf16 %v262_v21, %v261_v14 }
  0x54   : > { %v1181_v37 = vld [vmem:[%s1900_s5 + $0xa2] sm:$0xff]  ;;  %v1412_v41 = vpack.c.bf16 %v294_v27, %v293_v26  ;;  %1379 = vmatprep.subr.bf16.mxu0 %v1378_v19  ;;  %v281_v48 = vld [vmem:[%s1902_s6 + $0xd0] sm:$0xff]  ;;  %v282_v50 = vld [vmem:[%s1902_s6 + $0xd8] sm:$0xff] }
  0x55   : > { %v312_v38 = vld [vmem:[%s1902_s6 + $0x1c8] sm:$0xff]  ;;  %1409 = vmatpush3.bf16.msra.mxu1 %v1408_v10  ;;  %v263_v42 = vld [vmem:[%s1902_s6 + $0x40] sm:$0xff]  ;;  %v1602_v49 = vpack.i.bf16 %v1181_v37, %v2034_v36  ;;  %v313_v53 = vld [vmem:[%s1902_s6 + $0x1d0] sm:$0xff]  ;;  %v1386_v0 = vpack.c.bf16 %v282_v50, %v281_v48 }
  0x56   : > { %v2039_v39 = vld [vmem:[%s1900_s5 + $0x84] sm:$0xff]  ;;  %1411 = vmatprep.subr.bf16.mxu1 %v1410_v20  ;;  %v1414_v45 = vpack.c.bf16 %v312_v38, %v311_v33  ;;  %v314_v54 = vld [vmem:[%s1902_s6 + $0x1d8] sm:$0xff]  ;;  %v2055_v56 = vld [vmem:[%s1900_s5 + $0x90] sm:$0xff]  ;;  %1381 = vmatpush3.bf16.msra.mxu0 %v1380_v40 }
  0x57   : > { %v264_v43 = vld [vmem:[%s1902_s6 + $0x48] sm:$0xff]  ;;  %v295_v46 = vld [vmem:[%s1902_s6 + $0x140] sm:$0xff]  ;;  %1593 = vrot.lane.b32.xlu0 %v1592_v30, %s1753_s8  ;;  %1598 = vrot.lane.b32.xlu1 %v1597_v34, %s1753_s8  ;;  %v1607_v55 = vpack.i.bf16 %v2039_v39, %v1938_v16  ;;  %v1418_v1 = vpack.c.bf16 %v314_v54, %v313_v53 }
  0x58   : > { %v296_v47 = vld [vmem:[%s1902_s6 + $0x148] sm:$0xff]  ;;  %v1182_v57 = vld [vmem:[%s1900_s5 + $0xb2] sm:$0xff]  ;;  %v1384_v60 = vpack.c.bf16 %v264_v43, %v263_v42  ;;  %1383 = vmatprep.subr.bf16.mxu0 %v1382_v44  ;;  %v283_v8 = vld [vmem:[%s1902_s6 + $0xe0] sm:$0xff] }
  0x59   : > { %v2059_v59 = vld [vmem:[%s1900_s5 + $0x94] sm:$0xff]  ;;  %1413 = vmatpush3.bf16.msra.mxu1 %v1412_v41  ;;  %v1416_v61 = vpack.c.bf16 %v296_v47, %v295_v46  ;;  %v1612_v10 = vpack.i.bf16 %v1182_v57, %v2055_v56  ;;  %v284_v11 = vld [vmem:[%s1902_s6 + $0xe8] sm:$0xff]  ;;  %v315_v13 = vld [vmem:[%s1902_s6 + $0x1e0] sm:$0xff] }
  0x5a   : > { %v265_v62 = vld [vmem:[%s1902_s6 + $0x50] sm:$0xff]  ;;  %v266_v63 = vld [vmem:[%s1902_s6 + $0x58] sm:$0xff]  ;;  %1415 = vmatprep.subr.bf16.mxu1 %v1414_v45  ;;  %v316_v14 = vld [vmem:[%s1902_s6 + $0x1e8] sm:$0xff]  ;;  %v1617_v19 = vpack.i.bf16 %v2059_v59, %v1957_v23  ;;  %1385 = vmatpush3.bf16.msra.mxu0 %v1384_v60  ;;  %v1390_v30 = vpack.c.bf16 %v284_v11, %v283_v8 }
  0x5b   : > { %v297_v5 = vld [vmem:[%s1902_s6 + $0x150] sm:$0xff]  ;;  %v298_v6 = vld [vmem:[%s1902_s6 + $0x158] sm:$0xff]  ;;  %1603 = vrot.lane.b32.xlu0 %v1602_v49, %s1753_s8  ;;  %1608 = vrot.lane.b32.xlu1 %v1607_v55, %s1753_s8  ;;  %v1388_v20 = vpack.c.bf16 %v266_v63, %v265_v62  ;;  %v1422_v31 = vpack.c.bf16 %v316_v14, %v315_v13 }
  0x5c   : > { %v1420_v21 = vpack.c.bf16 %v298_v6, %v297_v5  ;;  %v267_v26 = vld [vmem:[%s1902_s6 + $0x60] sm:$0xff]  ;;  %v268_v27 = vld [vmem:[%s1902_s6 + $0x68] sm:$0xff]  ;;  %1387 = vmatprep.subr.bf16.mxu0 %v1386_v0  ;;  %v285_v34 = vld [vmem:[%s1902_s6 + $0xf0] sm:$0xff] }
  0x5d   : > { %1417 = vmatpush3.bf16.msra.mxu1 %v1416_v61  ;;  %v299_v32 = vld [vmem:[%s1902_s6 + $0x160] sm:$0xff]  ;;  %v300_v33 = vld [vmem:[%s1902_s6 + $0x168] sm:$0xff]  ;;  %v286_v37 = vld [vmem:[%s1902_s6 + $0xf8] sm:$0xff]  ;;  %v1392_v41 = vpack.c.bf16 %v268_v27, %v267_v26 }
  0x5e   : > { %1419 = vmatprep.subr.bf16.mxu1 %v1418_v1  ;;  %v317_v38 = vld [vmem:[%s1902_s6 + $0x1f0] sm:$0xff]  ;;  %v318_v40 = vld [vmem:[%s1902_s6 + $0x1f8] sm:$0xff]  ;;  %1389 = vmatpush3.bf16.msra.mxu0 %v1388_v20  ;;  %v1424_v42 = vpack.c.bf16 %v300_v33, %v299_v32  ;;  %v1394_v44 = vpack.c.bf16 %v286_v37, %v285_v34  ;;  %v319_v49 = vld [vmem:[%s1902_s6 + $0x200] sm:$0xff] }
  0x5f   : > { %1613 = vrot.lane.b32.xlu0 %v1612_v10, %s1753_s8  ;;  %1618 = vrot.lane.b32.xlu1 %v1617_v19, %s1753_s8  ;;  %v269_v43 = vld [vmem:[%s1902_s6 + $0x70] sm:$0xff]  ;;  %v1426_v45 = vpack.c.bf16 %v318_v40, %v317_v38  ;;  %v270_v46 = vld [vmem:[%s1902_s6 + $0x78] sm:$0xff] }
  0x60   : > { %1391 = vmatprep.subr.bf16.mxu0 %v1390_v30  ;;  %v301_v47 = vld [vmem:[%s1902_s6 + $0x170] sm:$0xff]  ;;  %v302_v48 = vld [vmem:[%s1902_s6 + $0x178] sm:$0xff]  ;;  %v320_v50 = vld [vmem:[%s1902_s6 + $0x208] sm:$0xff]  ;;  %v1396_v53 = vpack.c.bf16 %v270_v46, %v269_v43 }
  0x61   : > { %1421 = vmatpush3.bf16.msra.mxu1 %v1420_v21  ;;  %v1428_v54 = vpack.c.bf16 %v302_v48, %v301_v47  ;;  %v1430_v55 = vpack.c.bf16 %v320_v50, %v319_v49  ;;  %v343_v60 = vld [vmem:[%s1900_s5 + $0x4] sm:$0xff]  ;;  %v321_v8 = vld [vmem:[%s1902_s6 + $0x210] sm:$0xff]  ;;  %v322_v10 = vld [vmem:[%s1902_s6 + $0x218] sm:$0xff] }
  0x62   : > { %1423 = vmatprep.subr.bf16.mxu1 %v1422_v31  ;;  %1393 = vmatpush3.bf16.msra.mxu0 %v1392_v41  ;;  %v327_v13 = vld [vmem:[%s1900_s5] sm:$0xff]  ;;  %v344_v14 = vld [vmem:[%s1900_s5 + $0x14] sm:$0xff]  ;;  %v1434_v31 = vpack.c.bf16 %v322_v10, %v321_v8  ;;  %v324_v41 = vld [vmem:[%s1902_s6 + $0x228] sm:$0xff] }
  0x63   : > { %1395 = vmatprep.subr.bf16.mxu0 %v1394_v44  ;;  %v328_v30 = vld [vmem:[%s1900_s5 + $0x10] sm:$0xff]  ;;  %v323_v40 = vld [vmem:[%s1902_s6 + $0x220] sm:$0xff] }
  0x64   : > { %v1438_v50 = vpack.c.bf16 %v324_v41, %v323_v40 }
  0x65   : > { %1425 = vmatpush3.bf16.msra.mxu1 %v1424_v42 }
  0x66   : > { %1427 = vmatprep.subr.bf16.mxu1 %v1426_v45  ;;  %1397 = vmatpush3.bf16.msra.mxu0 %v1396_v53 }
  0x67   : > { %1431 = vmatprep.subr.bf16.mxu0 %v1430_v55 }
  0x69   : > { %1429 = vmatpush3.bf16.msra.mxu1 %v1428_v54  ;;  %v325_v54 = vld [vmem:[%s1902_s6 + $0x230] sm:$0xff] }
  0x6a   : > { %1446 = vmatprep.subr.bf16.mxu1 %v1430_v55 }
  0xb5   : > { %v1544_v57 = vpop.permute.xlu0 %1543  ;;  %v1554_v63 = vpop.permute.xlu1 %1553 }
  0xb6   : > { %v1546_v61 = vunpack.i.h.bf16 %v1544_v57  ;;  %v1545_v62 = vunpack.i.l.bf16 %v1544_v57  ;;  %v1556_v0 = vunpack.i.h.bf16 %v1554_v63  ;;  %v1555_v1 = vunpack.i.l.bf16 %v1554_v63 }
  0xb8   : > { %v538_v5 = vsel %vm529_vm0, %v343_v60, %v1545_v62  ;;  %v554_v6 = vsel %vm529_vm0, %v1935_v15, %v1546_v61  ;;  %v539_v34 = vsel %vm529_vm0, %v344_v14, %v1555_v1  ;;  %v555_v37 = vsel %vm529_vm0, %v1954_v22, %v1556_v0 }
  0xb9   : > { %650 = vmatprep.mubr.f32.mxu0 %v538_v5  ;;  %755 = vmatprep.mubr.f32.mxu1 %v554_v6  ;;  %v1549_v11 = vpop.permute.xlu0 %1548  ;;  %v1559_v21 = vpop.permute.xlu1 %1558 }
  0xba   : > { %v1551_v19 = vunpack.i.h.bf16 %v1549_v11  ;;  %v1550_v20 = vunpack.i.l.bf16 %v1549_v11  ;;  %v1561_v26 = vunpack.i.h.bf16 %v1559_v21  ;;  %v1560_v27 = vunpack.i.l.bf16 %v1559_v21 }
  0xbc   : > { %v530_v32 = vsel %vm529_vm0, %v327_v13, %v1550_v20  ;;  %v546_v33 = vsel %vm529_vm0, %v1941_v17, %v1551_v19  ;;  %v531_v45 = vsel %vm529_vm0, %v328_v30, %v1560_v27  ;;  %v547_v17 = vsel %vm529_vm0, %v1960_v24, %v1561_v26 }
  0xbd   : > { %651 = vmatmul.mubr.f32.vlgmr.msra.gmra.mrb[0].mxu0 %v530_v32  ;;  %756 = vmatmul.mubr.f32.vlgmr.msra.gmra.mrb[0].mxu1 %v546_v33  ;;  %v1564_v38 = vpop.permute.xlu0 %1563  ;;  %v1569_v44 = vpop.permute.xlu1 %1568 }
  0xbe   : > { %1433 = vmatpush3.bf16.msra.mxu0 %v1430_v55  ;;  %1450 = vmatpush3.bf16.msra.mxu1 %v1430_v55  ;;  %v1566_v42 = vunpack.i.h.bf16 %v1564_v38  ;;  %v1565_v43 = vunpack.i.l.bf16 %v1564_v38  ;;  %v1571_v46 = vunpack.i.h.bf16 %v1569_v44  ;;  %v1570_v47 = vunpack.i.l.bf16 %v1569_v44  ;;  %v326_v55 = vld [vmem:[%s1902_s6 + $0x238] sm:$0xff] }
  0xbf   : > { %655 = vmatprep.mubr.f32.mxu0 %v539_v34  ;;  %760 = vmatprep.mubr.f32.mxu1 %v555_v37  ;;  %v1442_v5 = vpack.c.bf16 %v326_v55, %v325_v54  ;;  %v1173_v34 = vld [vmem:[%s1900_s5 + $0xa0] sm:$0xff] }
  0xc0   : > { %v540_v48 = vsel %vm529_vm0, %v1922_v9, %v1565_v43  ;;  %v556_v49 = vsel %vm529_vm0, %v1968_v28, %v1566_v42  ;;  %1435 = vmatprep.subr.bf16.mxu0 %v1434_v31  ;;  %1447 = vmatprep.subr.bf16.mxu1 %v1434_v31  ;;  %v532_v61 = vsel %vm529_vm0, %v1907_v2, %v1570_v47 }
  0xc1   : > { %656 = vmatmul.mubr.f32.gmra.mrb[2].mxu0 %v531_v45  ;;  %761 = vmatmul.mubr.f32.gmra.mrb[2].mxu1 %v547_v17  ;;  %v1574_v53 = vpop.permute.xlu0 %1573  ;;  %v1579_v60 = vpop.permute.xlu1 %1578  ;;  %v548_v9 = vsel %vm529_vm0, %v1910_v3, %v1571_v46  ;;  %v1174_v45 = vld [vmem:[%s1900_s5 + $0xb0] sm:$0xff] }
  0xc2   : > { %v1576_v57 = vunpack.i.h.bf16 %v1574_v53  ;;  %v1575_v24 = vunpack.i.l.bf16 %v1574_v53  ;;  %660 = vmatprep.mubr.f32.mxu0 %v540_v48  ;;  %765 = vmatprep.mubr.f32.mxu1 %v556_v49  ;;  %v1581_v62 = vunpack.i.h.bf16 %v1579_v60  ;;  %v1580_v63 = vunpack.i.l.bf16 %v1579_v60 }
  0xc3   : > { %1437 = vmatpush3.bf16.msra.mxu0 %v1434_v31  ;;  %1451 = vmatpush3.bf16.msra.mxu1 %v1434_v31 }
  0xc4   : > { %v541_v0 = vsel %vm529_vm0, %v1928_v12, %v1575_v24  ;;  %v557_v1 = vsel %vm529_vm0, %v1995_v51, %v1576_v57  ;;  %1439 = vmatprep.subr.bf16.mxu0 %v1438_v50  ;;  %1448 = vmatprep.subr.bf16.mxu1 %v1438_v50  ;;  %v533_v10 = vsel %vm529_vm0, %v1913_v4, %v1580_v63 }
  0xc5   : > { %661 = vmatmul.mubr.f32.gmra.mrb[4].mxu0 %v532_v61  ;;  %766 = vmatmul.mubr.f32.gmra.mrb[4].mxu1 %v548_v9  ;;  %v1584_v6 = vpop.permute.xlu0 %1583  ;;  %v1589_v3 = vpop.permute.xlu1 %1588  ;;  %v549_v12 = vsel %vm529_vm0, %v1918_v7, %v1581_v62 }
  0xc6   : > { %v1586_v2 = vunpack.i.h.bf16 %v1584_v6  ;;  %v1585_v8 = vunpack.i.l.bf16 %v1584_v6  ;;  %665 = vmatprep.mubr.f32.mxu0 %v541_v0  ;;  %770 = vmatprep.mubr.f32.mxu1 %v557_v1  ;;  %v1591_v11 = vunpack.i.h.bf16 %v1589_v3  ;;  %v1590_v13 = vunpack.i.l.bf16 %v1589_v3 }
  0xc7   : > { %1441 = vmatpush3.bf16.msra.mxu0 %v1438_v50  ;;  %1452 = vmatpush3.bf16.msra.mxu1 %v1438_v50 }
  0xc8   : > { %v542_v14 = vsel %vm529_vm0, %v1944_v18, %v1585_v8  ;;  %v558_v19 = vsel %vm529_vm0, %v2034_v36, %v1586_v2  ;;  %1443 = vmatprep.subr.bf16.mxu0 %v1442_v5  ;;  %1449 = vmatprep.subr.bf16.mxu1 %v1442_v5  ;;  %v534_v26 = vsel %vm529_vm0, %v1935_v15, %v1590_v13 }
  0xc9   : > { %666 = vmatmul.mubr.f32.gmra.mrb[6].mxu0 %v533_v10  ;;  %771 = vmatmul.mubr.f32.gmra.mrb[6].mxu1 %v549_v12  ;;  %v1594_v20 = vpop.permute.xlu0 %1593  ;;  %v1599_v7 = vpop.permute.xlu1 %1598  ;;  %v550_v27 = vsel %vm529_vm0, %v1938_v16, %v1591_v11 }
  0xca   : > { %v1596_v21 = vunpack.i.h.bf16 %v1594_v20  ;;  %v1595_v4 = vunpack.i.l.bf16 %v1594_v20  ;;  %670 = vmatprep.mubr.f32.mxu0 %v542_v14  ;;  %775 = vmatprep.mubr.f32.mxu1 %v558_v19  ;;  %v1601_v30 = vunpack.i.h.bf16 %v1599_v7  ;;  %v1600_v31 = vunpack.i.l.bf16 %v1599_v7 }
  0xcb   : > { %1445 = vmatpush3.bf16.msra.mxu0 %v1442_v5  ;;  %1453 = vmatpush3.bf16.msra.mxu1 %v1442_v5 }
  0xcc   : > { %v543_v36 = vsel %vm529_vm0, %v1963_v25, %v1595_v4  ;;  %v559_v32 = vsel %vm529_vm0, %v2055_v56, %v1596_v21  ;;  %v535_v38 = vsel %vm529_vm0, %v1954_v22, %v1600_v31  ;;  %v551_v40 = vsel %vm529_vm0, %v1957_v23, %v1601_v30 }
  0xcd   : > { %671 = vmatmul.mubr.f32.gmra.mrb[8].mxu0 %v534_v26  ;;  %776 = vmatmul.mubr.f32.gmra.mrb[8].mxu1 %v550_v27  ;;  %v1604_v33 = vpop.permute.xlu0 %1603  ;;  %v1609_v16 = vpop.permute.xlu1 %1608 }
  0xce   : > { %v1606_v37 = vunpack.i.h.bf16 %v1604_v33  ;;  %v1605_v15 = vunpack.i.l.bf16 %v1604_v33  ;;  %675 = vmatprep.mubr.f32.mxu0 %v543_v36  ;;  %780 = vmatprep.mubr.f32.mxu1 %v559_v32  ;;  %v1611_v41 = vunpack.i.h.bf16 %v1609_v16  ;;  %v1610_v42 = vunpack.i.l.bf16 %v1609_v16 }
  0xd0   : > { %v544_v56 = vsel %vm529_vm0, %v1980_v35, %v1605_v15  ;;  %v560_v43 = vsel %vm529_vm0, %v1173_v34, %v1606_v37  ;;  %v536_v22 = vsel %vm529_vm0, %v1968_v28, %v1610_v42  ;;  %v552_v23 = vsel %vm529_vm0, %v1971_v29, %v1611_v41  ;;  %v1189_v29 = vld [vmem:[%s1900_s5 + $0xa4] sm:$0xff] }
  0xd1   : > { %676 = vmatmul.mubr.f32.gmra.mrb[10].mxu0 %v535_v38  ;;  %781 = vmatmul.mubr.f32.gmra.mrb[10].mxu1 %v551_v40  ;;  %v1614_v44 = vpop.permute.xlu0 %1613  ;;  %v1619_v47 = vpop.permute.xlu1 %1618 }
  0xd2   : > { %v1616_v17 = vunpack.i.h.bf16 %v1614_v44  ;;  %v1615_v46 = vunpack.i.l.bf16 %v1614_v44  ;;  %680 = vmatprep.mubr.f32.mxu0 %v544_v56  ;;  %785 = vmatprep.mubr.f32.mxu1 %v560_v43  ;;  %v1621_v48 = vunpack.i.h.bf16 %v1619_v47  ;;  %v1620_v49 = vunpack.i.l.bf16 %v1619_v47 }
  0xd4   : > { %v545_v50 = vsel %vm529_vm0, %v2007_v58, %v1615_v46  ;;  %v561_v53 = vsel %vm529_vm0, %v1174_v45, %v1616_v17  ;;  %v537_v54 = vsel %vm529_vm0, %v1995_v51, %v1620_v49  ;;  %v553_v28 = vsel %vm529_vm0, %v1998_v52, %v1621_v48  ;;  %v1190_v51 = vld [vmem:[%s1900_s5 + $0xb4] sm:$0xff] }
  0xd5   : > { %681 = vmatmul.mubr.f32.gmra.mrb[12].mxu0 %v536_v22  ;;  %786 = vmatmul.mubr.f32.gmra.mrb[12].mxu1 %v552_v23 }
  0xd6   : > { %685 = vmatprep.mubr.f32.mxu0 %v545_v50  ;;  %790 = vmatprep.mubr.f32.mxu1 %v561_v53 }
  0xd9   : > { %686 = vmatmul.mubr.f32.gmra.mrb[14].mxu0 %v537_v54  ;;  %791 = vmatmul.mubr.f32.gmra.mrb[14].mxu1 %v553_v28 }
  0xda   : > { %1354 = vmatprep.mubr.msk.f32.mxu0 %vm529_vm0, %v1944_v18  ;;  %1360 = vmatprep.mubr.msk.f32.mxu1 %vm529_vm0, %v2039_v39 }
  0xdd   : > { %1355 = vmatmul.mubr.msk.f32.vlgmr.msra.gmra.mrb[16].mxu0 %vm529_vm0, %v1963_v25  ;;  %1361 = vmatmul.mubr.msk.f32.vlgmr.msra.gmra.mrb[16].mxu1 %vm529_vm0, %v2059_v59 }
  0xde   : > { %1357 = vmatprep.mubr.msk.f32.mxu0 %vm529_vm0, %v1980_v35  ;;  %1363 = vmatprep.mubr.msk.f32.mxu1 %vm529_vm0, %v1189_v29 }
  0xe1   : > { %1358 = vmatmul.mubr.msk.f32.gmra.mrb[18].mxu0 %vm529_vm0, %v2007_v58  ;;  %1364 = vmatmul.mubr.msk.f32.gmra.mrb[18].mxu1 %vm529_vm0, %v1190_v51 }
 0x190   : > { %v1242_v18 = vpop.f32.mrb[0].mxu0  ;;  %v1298_v52 = vpop.f32.mrb[0].mxu1 }
 0x191   : > { %v1243_v39 = vpop.f32.mrb[1].mxu0  ;;  %v1299_v55 = vpop.f32.mrb[1].mxu1 }
 0x192   : > { %v1244_v57 = vadd.f32 %v1243_v39, %v1242_v18  ;;  %v1300_v25 = vadd.f32 %v1299_v55, %v1298_v52 }
 0x194   : > { %v1245_v24 = vpop.f32.mrb[2].mxu0  ;;  %v1301_v60 = vpop.f32.mrb[2].mxu1  ;;  %v758_v59 = vadd.f32 %v1300_v25, %v1244_v57 }
 0x195   : > { %v1246_v61 = vpop.f32.mrb[3].mxu0  ;;  %v1302_v9 = vpop.f32.mrb[3].mxu1 }
 0x196   : > { %v1247_v35 = vadd.f32 %v1246_v61, %v1245_v24  ;;  %v1303_v62 = vadd.f32 %v1302_v9, %v1301_v60 }
 0x198   : > { %v1248_v63 = vpop.f32.mrb[4].mxu0  ;;  %v1304_v0 = vpop.f32.mrb[4].mxu1  ;;  %v763_v1 = vadd.f32 %v1303_v62, %v1247_v35 }
 0x199   : > { %v1249_v5 = vpop.f32.mrb[5].mxu0  ;;  %v1305_v58 = vpop.f32.mrb[5].mxu1 }
 0x19a   : > { %v1250_v6 = vadd.f32 %v1249_v5, %v1248_v63  ;;  %v1306_v2 = vadd.f32 %v1305_v58, %v1304_v0 }
 0x19c   : > { %v1251_v8 = vpop.f32.mrb[6].mxu0  ;;  %v1307_v3 = vpop.f32.mrb[6].mxu1  ;;  %v768_v10 = vadd.f32 %v1306_v2, %v1250_v6 }
 0x19d   : > { %v1252_v12 = vpop.f32.mrb[7].mxu0  ;;  %v1308_v11 = vpop.f32.mrb[7].mxu1 }
 0x19e   : > { %v1253_v13 = vadd.f32 %v1252_v12, %v1251_v8  ;;  %v1309_v14 = vadd.f32 %v1308_v11, %v1307_v3 }
 0x1a0   : > { %v1254_v19 = vpop.f32.mrb[8].mxu0  ;;  %v1310_v20 = vpop.f32.mrb[8].mxu1  ;;  %v773_v21 = vadd.f32 %v1309_v14, %v1253_v13 }
 0x1a1   : > { %v1255_v4 = vpop.f32.mrb[9].mxu0  ;;  %v1311_v7 = vpop.f32.mrb[9].mxu1 }
 0x1a2   : > { %v1256_v26 = vadd.f32 %v1255_v4, %v1254_v19  ;;  %v1312_v27 = vadd.f32 %v1311_v7, %v1310_v20 }
 0x1a4   : > { %v1257_v30 = vpop.f32.mrb[10].mxu0  ;;  %v1313_v31 = vpop.f32.mrb[10].mxu1  ;;  %v778_v36 = vadd.f32 %v1312_v27, %v1256_v26 }
 0x1a5   : > { %v1258_v32 = vpop.f32.mrb[11].mxu0  ;;  %v1314_v33 = vpop.f32.mrb[11].mxu1 }
 0x1a6   : > { %v1259_v34 = vadd.f32 %v1258_v32, %v1257_v30  ;;  %v1315_v37 = vadd.f32 %v1314_v33, %v1313_v31 }
 0x1a8   : > { %v1260_v15 = vpop.f32.mrb[12].mxu0  ;;  %v1316_v16 = vpop.f32.mrb[12].mxu1  ;;  %v783_v38 = vadd.f32 %v1315_v37, %v1259_v34 }
 0x1a9   : > { %v1261_v40 = vpop.f32.mrb[13].mxu0  ;;  %v1317_v41 = vpop.f32.mrb[13].mxu1 }
 0x1aa   : > { %v1262_v42 = vadd.f32 %v1261_v40, %v1260_v15  ;;  %v1318_v56 = vadd.f32 %v1317_v41, %v1316_v16 }
 0x1ac   : > { %v1263_v43 = vpop.f32.mrb[14].mxu0  ;;  %v1319_v44 = vpop.f32.mrb[14].mxu1  ;;  %v788_v45 = vadd.f32 %v1318_v56, %v1262_v42 }
 0x1ad   : > { %v1264_v17 = vpop.f32.mrb[15].mxu0  ;;  %v1320_v46 = vpop.f32.mrb[15].mxu1 }
 0x1ae   : > { %v1265_v47 = vadd.f32 %v1264_v17, %v1263_v43  ;;  %v1321_v22 = vadd.f32 %v1320_v46, %v1319_v44 }
 0x1b0   : > { %v1356_v23 = vpop.f32.mrb[16].mxu0  ;;  %v1362_v48 = vpop.f32.mrb[16].mxu1  ;;  %v793_v49 = vadd.f32 %v1321_v22, %v1265_v47  ;;  %904 = sbr.rel (%p1199_p9) target bundleno = 441 (0x1b9), region = 44 }
 0x1b1   : > { %v868_v50 = vadd.f32 %v1356_v23, %v763_v1  ;;  %v888_v53 = vadd.f32 %v1362_v48, %v783_v38  ;;  %v862_v54 = vpop.f32.mrb[17].mxu0  ;;  %v882_v28 = vpop.f32.mrb[17].mxu1 }
 0x1b2   : > { %v863_v29 = vadd.f32 %v862_v54, %v758_v59  ;;  %v883_v51 = vadd.f32 %v882_v28, %v778_v36 }
 0x1b3   : > { %906 = vst [vmem:[#allocation2 + $0x8] sm:$0xff] (!%p1199_p9), %v868_v50  ;;  %910 = vst [vmem:[#allocation2 + $0x28] sm:$0xff] (!%p1199_p9), %v888_v53 }
 0x1b4   : > { %v1359_v18 = vpop.f32.mrb[18].mxu0  ;;  %v1365_v52 = vpop.f32.mrb[18].mxu1  ;;  %905 = vst [vmem:[#allocation2] sm:$0xff] (!%p1199_p9), %v863_v29  ;;  %909 = vst [vmem:[#allocation2 + $0x20] sm:$0xff] (!%p1199_p9), %v883_v51 }
 0x1b5   : > { %v878_v39 = vadd.f32 %v1359_v18, %v773_v21  ;;  %v898_v55 = vadd.f32 %v1365_v52, %v793_v49  ;;  %v872_v57 = vpop.f32.mrb[19].mxu0  ;;  %v892_v25 = vpop.f32.mrb[19].mxu1 }
 0x1b6   : > { %v873_v24 = vadd.f32 %v872_v57, %v768_v10  ;;  %v893_v60 = vadd.f32 %v892_v25, %v788_v45 }
 0x1b7   : > { %908 = vst [vmem:[#allocation2 + $0x18] sm:$0xff] %v878_v39  ;;  %912 = vst [vmem:[#allocation2 + $0x38] sm:$0xff] %v898_v55 }
 0x1b8   : > { %907 = vst [vmem:[#allocation2 + $0x10] sm:$0xff] %v873_v24  ;;  %911 = vst [vmem:[#allocation2 + $0x30] sm:$0xff] %v893_v60 }
 0x1b9 PF: > { %p1200_p10 = scmp.le.s32.totalorder %s1732_s18, 0 }
 0x1bb   : > { %916 = sbr.rel (%p1200_p10) target bundleno = 453 (0x1c5), region = 48 }
 0x1bc   : > { %v918_v61 = vld [vmem:[#allocation2 + $0x8] sm:$0xff] (!%p1200_p10) }
 0x1bd   : > { %v917_v59 = vld [vmem:[#allocation2] sm:$0xff] (!%p1200_p10)  ;;  %v926_v62 = vadd.f32 (!%p1200_p10), %v918_v61, %v868_v50  ;;  %v922_v5 = vld [vmem:[#allocation2 + $0x28] sm:$0xff] (!%p1200_p10) }
 0x1be   : > { %v925_v35 = vadd.f32 (!%p1200_p10), %v917_v59, %v863_v29  ;;  %v921_v1 = vld [vmem:[#allocation2 + $0x20] sm:$0xff] (!%p1200_p10)  ;;  %v930_v2 = vadd.f32 (!%p1200_p10), %v922_v5, %v888_v53 }
 0x1bf   : > { %v919_v9 = vld [vmem:[#allocation2 + $0x10] sm:$0xff] (!%p1200_p10)  ;;  %v929_v6 = vadd.f32 (!%p1200_p10), %v921_v1, %v883_v51  ;;  %934 = vst [vmem:[#allocation2 + $0x8] sm:$0xff] (!%p1200_p10), %v926_v62 }
 0x1c0   : > { %v927_v63 = vadd.f32 (!%p1200_p10), %v919_v9, %v873_v24  ;;  %v920_v0 = vld [vmem:[#allocation2 + $0x18] sm:$0xff] (!%p1200_p10)  ;;  %v923_v8 = vld [vmem:[#allocation2 + $0x30] sm:$0xff] (!%p1200_p10)  ;;  %933 = vst [vmem:[#allocation2] sm:$0xff] (!%p1200_p10), %v925_v35  ;;  %938 = vst [vmem:[#allocation2 + $0x28] sm:$0xff] (!%p1200_p10), %v930_v2 }
 0x1c1   : > { %v928_v58 = vadd.f32 (!%p1200_p10), %v920_v0, %v878_v39  ;;  %v924_v3 = vld [vmem:[#allocation2 + $0x38] sm:$0xff] (!%p1200_p10)  ;;  %v931_v10 = vadd.f32 (!%p1200_p10), %v923_v8, %v893_v60  ;;  %937 = vst [vmem:[#allocation2 + $0x20] sm:$0xff] (!%p1200_p10), %v929_v6 }
 0x1c2   : > { %935 = vst [vmem:[#allocation2 + $0x10] sm:$0xff] %v927_v63  ;;  %v932_v12 = vadd.f32 %v924_v3, %v898_v55 }
 0x1c3   : > { %936 = vst [vmem:[#allocation2 + $0x18] sm:$0xff] %v928_v58  ;;  %939 = vst [vmem:[#allocation2 + $0x30] sm:$0xff] %v931_v10 }
 0x1c4   : > { %940 = vst [vmem:[#allocation2 + $0x38] sm:$0xff] %v932_v12 }
 0x1c5 PF: > { %p1201_p13 = scmp.ne.s32.totalorder %s1732_s18, 2 }
 0x1c6   : > { %v1202_v13 = vld [vmem:[%s2269_s2] ss:$0 sm:$0xff] (!%p1201_p13)  ;;  %vm1007_vm1 = vcmask (!%p1201_p13), 130048  }
 0x1c7   : > { %944 = sbr.rel (%p1201_p13) target bundleno = 472 (0x1d8), region = 52  ;;  %v1203_v14 = vld [vmem:[%s2270_s3] ss:$0 sm:$0xff] (!%p1201_p13) }
 0x1c9   : > { %v946_v20 = vld [vmem:[#allocation2 + $0x8] sm:$0xff] (!%p1201_p13) }
 0x1ca   : > { %v945_v11 = vld [vmem:[#allocation2] sm:$0xff] (!%p1201_p13)  ;;  %v948_v4 = vld [vmem:[#allocation2 + $0x18] sm:$0xff] (!%p1201_p13)  ;;  %v961_v7 = vmul.f32 (!%p1201_p13), %v1202_v13, %v946_v20  ;;  %v950_v31 = vld [vmem:[#allocation2 + $0x28] sm:$0xff] (!%p1201_p13) }
 0x1cb   : > { %v960_v19 = vmul.f32 (!%p1201_p13), %v1202_v13, %v945_v11  ;;  %v963_v27 = vmul.f32 (!%p1201_p13), %v1202_v13, %v948_v4  ;;  %v949_v30 = vld [vmem:[#allocation2 + $0x20] sm:$0xff] (!%p1201_p13)  ;;  %v951_v36 = vld [vmem:[#allocation2 + $0x30] sm:$0xff] (!%p1201_p13)  ;;  %v965_v34 = vmul.f32 (!%p1201_p13), %v1202_v13, %v950_v31  ;;  %v952_v15 = vld [vmem:[#allocation2 + $0x38] sm:$0xff] (!%p1201_p13) }
 0x1cc   : > { %v947_v21 = vld [vmem:[#allocation2 + $0x10] sm:$0xff] (!%p1201_p13)  ;;  %v964_v33 = vmul.f32 (!%p1201_p13), %v1202_v13, %v949_v30  ;;  %v966_v37 = vmul.f32 (!%p1201_p13), %v1202_v13, %v951_v36  ;;  %v976_v16 = vadd.f32 (!%p1201_p13), %v1203_v14, %v961_v7  ;;  %v967_v41 = vmul.f32 (!%p1201_p13), %v1202_v13, %v952_v15 }
 0x1cd   : > { %v962_v26 = vmul.f32 (!%p1201_p13), %v1202_v13, %v947_v21  ;;  %v975_v32 = vadd.f32 (!%p1201_p13), %v1203_v14, %v960_v19  ;;  %v978_v40 = vadd.f32 (!%p1201_p13), %v1203_v14, %v963_v27  ;;  %v980_v43 = vadd.f32 (!%p1201_p13), %v1203_v14, %v965_v34 }
 0x1ce   : > { %v979_v56 = vadd.f32 %v1203_v14, %v964_v33  ;;  %vm984_vm3 = vcmp.ge.f32.partialorder %v976_v16, 0.0  ;;  %v992_v44 = vmul.f32 0.2, %v976_v16  ;;  %v981_v50 = vadd.f32 %v1203_v14, %v966_v37 }
 0x1cf   : > { %v977_v38 = vadd.f32 %v1203_v14, %v962_v26  ;;  %vm983_vm2 = vcmp.ge.f32.partialorder %v975_v32, 0.0  ;;  %v991_v42 = vmul.f32 0.2, %v975_v32  ;;  %vm986_vm5 = vcmp.ge.f32.partialorder %v978_v40, 0.0 }
 0x1d0   : > { %v994_v46 = vmul.f32 0.2, %v978_v40  ;;  %vm987_vm6 = vcmp.ge.f32.partialorder %v979_v56, 0.0  ;;  %v1000_v47 = vsel %vm984_vm3, %v976_v16, %v992_v44  ;;  %v995_v23 = vmul.f32 0.2, %v979_v56 }
 0x1d1   : > { %vm985_vm4 = vcmp.ge.f32.partialorder %v977_v38, 0.0  ;;  %v993_v45 = vmul.f32 0.2, %v977_v38  ;;  %v999_v17 = vsel %vm983_vm2, %v975_v32, %v991_v42  ;;  %vm988_vm7 = vcmp.ge.f32.partialorder %v980_v43, 0.0  ;;  %1009 = vst.msk [vmem:[%s2177_s11 + $0x8] sm:$0xff] %vm1007_vm1, %v1000_v47 }
 0x1d2   : > { %1008 = vst.msk [vmem:[%s2177_s11] sm:$0xff] %vm1007_vm1, %v999_v17  ;;  %v1002_v48 = vsel %vm986_vm5, %v978_v40, %v994_v46  ;;  %v996_v49 = vmul.f32 0.2, %v980_v43  ;;  %v982_v53 = vadd.f32 %v1203_v14, %v967_v41  ;;  %v1003_v54 = vsel %vm987_vm6, %v979_v56, %v995_v23 }
 0x1d3   : > { %v1001_v22 = vsel %vm985_vm4, %v977_v38, %v993_v45  ;;  %1011 = vst.msk [vmem:[%s2177_s11 + $0x18] sm:$0xff] %vm1007_vm1, %v1002_v48  ;;  %1012 = vst.msk [vmem:[%s2177_s11 + $0x20] sm:$0xff] %vm1007_vm1, %v1003_v54  ;;  %vm989_vm8 = vcmp.ge.f32.partialorder %v981_v50, 0.0  ;;  %v997_v29 = vmul.f32 0.2, %v981_v50 }
 0x1d4   : > { %1010 = vst.msk [vmem:[%s2177_s11 + $0x10] sm:$0xff] %vm1007_vm1, %v1001_v22  ;;  %v1004_v28 = vsel %vm988_vm7, %v980_v43, %v996_v49  ;;  %vm990_vm9 = vcmp.ge.f32.partialorder %v982_v53, 0.0  ;;  %v998_v51 = vmul.f32 0.2, %v982_v53 }
 0x1d5   : > { %1013 = vst.msk [vmem:[%s2177_s11 + $0x28] sm:$0xff] %vm1007_vm1, %v1004_v28  ;;  %v1005_v18 = vsel %vm989_vm8, %v981_v50, %v997_v29 }
 0x1d6   : > { %1014 = vst.msk [vmem:[%s2177_s11 + $0x30] sm:$0xff] %vm1007_vm1, %v1005_v18  ;;  %v1006_v52 = vsel %vm990_vm9, %v982_v53, %v998_v51 }
 0x1d7   : > { %1015 = vst.msk [vmem:[%s2177_s11 + $0x38] sm:$0xff] %vm1007_vm1, %v1006_v52 }
 0x1d8 PF: > { %s1209_s18 = sshll.u32 %s1736_s19, 10  ;;  %s1032_s27 = sshll.u32 %s2177_s11, 4  ;;  %s2211_s27 = int_to_ptr.vmem [resolvable:$true] %s1032_s27 }
 0x1d9   : > { %s2208_s24 = scalar_lea.hbm %s2271_s4, %s1209_s18  ;;  %s2215_s5 = scalar_lea.sflag [#allocation5], %s239_s10 }
 0x1da   : > { %s1650_s6 = scalar_lea.vmem %s2211_s27, 1024  ;;  %p2283_p2 = scmp.ne.s32.totalorder %s2276_s28, 0 }
 0x1db   : > { %p1651_p0 = scmp.ne.s32.totalorder %s2211_s27, %s1650_s6  ;;  %s1754_s19 = smov [#allocation6]  }
 0x1dc   : > { %s1654_s8 = sshll.u32 %s1754_s19, 4  ;;  %s1655_s8 = int_to_ptr.vmem [resolvable:$false] %s1654_s8 }
 0x1dd   : > { %p1652_p5 = pnand %p1651_p0, %p2283_p2  ;;  %s1656_s12 = scalar_lea.vmem %s1655_s8, 2048 }
 0x1de   : > { %p1657_p7 = scmp.lt.s32.totalorder %s2211_s27, %s1655_s8  ;;  %p1658_p8 = scmp.lt.s32.totalorder %s1656_s12, %s1650_s6 }
 0x1df   : > { %p1653_p6 = pneg %p1652_p5 }
 0x1e0   : > { %p1659_p11 = por %p1658_p8, %p1657_p7 }
 0x1e2   : > { %p1660_p12 = pnand %p1659_p11, %p1653_p6 }
 0x1e4   : > { %1663 = shalt.err (!%p1660_p12)
}
 0x1e5   : > { %s1664_s10 = scalar_lea.hbm %s2208_s24, 1024  ;;  %s1668_s13 = scalar_lea.hbm %s2271_s4, 3072 }
 0x1e6   : > { %p1665_p1 = scmp.ne.s32.totalorder %s2208_s24, %s1664_s10  ;;  %p1669_p9 = scmp.lt.u32.totalorder %s2208_s24, %s2271_s4 }
 0x1e7   : > { %p1670_p10 = scmp.lt.u32.totalorder %s1668_s13, %s1664_s10  ;;  %p1672_p0 = scmp.lt.u32.totalorder %s1664_s10, %s2208_s24 }
 0x1e8   : > { %p1666_p4 = pnand %p1665_p1, %p2283_p2 }
 0x1e9   : > { %p1671_p13 = por %p1670_p10, %p1669_p9 }
 0x1ea   : > { %p1667_p3 = pneg %p1666_p4 }
 0x1eb   : > { %p1673_p5 = por %p1672_p0, %p1671_p13 }
 0x1ed   : > { %p1674_p6 = pnand %p1673_p5, %p1667_p3 }
 0x1ef   : > { %1677 = shalt.err (!%p1674_p6)
}
 0x1f0   : > { %s1755_s9 = smov 128   ;;  %s1756_s30 = smov 8  }
 0x1f1   : > { %1459 = dma.vmem_to_hbm [thread:$0]  (%p2283_p2), %s2211_s27, 1024, %s2208_s24, %s2215_s5, %s1755_s9, %s1755_s9, %s1756_s30  }
 0x1f2 PF: > { %p1471_p7 = scmp.ge.s32.totalorder %s1748_s22, 2  ;;  %s1047_s6 = sand.u32 1, %s1720_s15  }
 0x1f3   : > { %p2284_p8 = scmp.ne.s32.totalorder %s2277_s29, 0  ;;  %s1048_s19 = scalar_lea.sflag [#allocation5], %s1047_s6 }
 0x1f5   : > { %p1466_p11 = pnand %p1471_p7, %p2284_p8 }
 0x1f7   : > { %1715 = dma.done.wait (!%p1466_p11), %s1048_s19, 1024  }
 0x1f8   : > { %1717 = vsyncadd (!%p1466_p11), %s1048_s19, 4294966272  ;;  %s18_s22 = sadd.s32 1, %s1748_s22   ;;  %s2285_s15 = smov %s1724_s16 }
 0x1f9   : > { %p15_p12 = scmp.ge.s32.totalorder %s18_s22, 11   ;;  %s2286_s16 = smov %s1728_s17 }
 0x1fa   : > { %s2287_s17 = smov %s1859_s7  ;;  %s2288_s18 = smov %s1740_s20 }
 0x1fb   : > { %s2289_s19 = smov %s1744_s21  ;;  %s2290_s20 = smov %s2293_s25 }
 0x1fc   : > { %s2291_s21 = smov %s2297_s26  ;;  %17 = sbr.rel (!%p15_p12) target bundleno = 6 (0x6), region = 91 }
 0x203   :  { %1053 = vsyncpa [#allocation4], 1 }
 0x204   :  { %1055 = vsyncpa [#allocation4 + $0x1], 1 }
 0x205   :  { %1056 = vsyncpa [#allocation5], 1 }
 0x206   :  { %1058 = vsyncpa [#allocation5 + $0x1], 1 }

</bundles_post_ra>
